<compile_context>
chip_gen: v5e
topology: v5e:2x2
jax: 0.10.0
libtpu: 0.0.40
codegen_flags: <defaults>
</compile_context>

<pallas_src>
import math
import functools

import jax
import jax.numpy as jnp
from jax import lax
from jax.experimental import pallas as pl
from jax.experimental.pallas import tpu as pltpu

NEG_BIG = -1e30   # large finite negative instead of -inf (no inf-inf risk)
VPAD = 128        # padded vocab rows for the one-hot embedding matmul
NPAD = 128        # padded lm_head output lanes (lane-dense store)


# ------------------------------ kernel helpers ------------------------------

def _ln(x, g, b):
    mean = jnp.mean(x, axis=-1, keepdims=True)
    var = jnp.mean((x - mean) ** 2, axis=-1, keepdims=True)
    return (x - mean) * lax.rsqrt(var + 1e-5) * g + b


def _gelu(x):
    # NewGELU: 0.5*x*(1+tanh(sqrt(2/pi)*(x+0.044715*x^3)))
    c = math.sqrt(2.0 / math.pi)
    return 0.5 * x * (1.0 + jnp.tanh(c * (x + 0.044715 * (x ** 3))))


# ------------------------------- fused kernel -------------------------------

def _gpt_kernel(*refs, T, D, H, hd, num_layer, use_rpe):
    out_ref = refs[-1]
    it = iter(refs[:-1])
    onehot_ref = next(it)                    # (T, VPAD)      f32 one-hot tokens
    tok_ref = next(it)                       # (VPAD, D)      bf16 embedding table
    pe_ref = None if use_rpe else next(it)   # (T, D)         f32 sinusoidal PE
    bias_ref = next(it)                      # (H, T, T)      f32 causal (+RPE) bias
    vecd_ref = next(it)                      # (4+6L, D)      f32 LN g/b + D-wide biases
    vecw_ref = next(it)                      # (L+1, 128)     f32 c_fc biases + lm_head bias
    battn_ref = next(it)                     # (3L, H, 1, hd) f32 q/k/v biases (q pre-scaled)
    wqkv_ref = next(it)                      # (3L, H, D, hd) bf16 q/k/v weights (q pre-scaled)
    wp_ref = next(it)                        # (L, H, hd, D)  bf16 per-head c_proj weights
    wf_ref = next(it)                        # (L, D, 4D)     bf16 c_fc weights
    wm_ref = next(it)                        # (L, 4D, D)     bf16 mlp c_proj weights
    wh_ref = next(it)                        # (D, NPAD)      bf16 lm_head weights

    f32 = jnp.float32
    bf16 = jnp.bfloat16

    # ---- embedding: one-hot @ table (gather stays in the kernel) ----
    x = jnp.dot(onehot_ref[...].astype(bf16), tok_ref[...],
                preferred_element_type=f32)                        # (T, D)
    if not use_rpe:
        x = x + pe_ref[...]
    x = _ln(x, vecd_ref[0], vecd_ref[1])
    # transformer.drop: p=0.0 -> identity

    bias = bias_ref[...]                                           # (H, T, T)

    for l in range(num_layer):
        r = 2 + 6 * l

        # ---- causal self-attention: all heads batched, no lane slicing ----
        h1 = _ln(x, vecd_ref[r + 0], vecd_ref[r + 1])
        h1b = jnp.broadcast_to(h1.astype(bf16)[None], (H, T, D))   # (H, T, D)
        q = jnp.einsum('htd,hdf->htf', h1b, wqkv_ref[3 * l + 0],
                       preferred_element_type=f32) + battn_ref[3 * l + 0]
        k = jnp.einsum('htd,hdf->htf', h1b, wqkv_ref[3 * l + 1],
                       preferred_element_type=f32) + battn_ref[3 * l + 1]
        v = jnp.einsum('htd,hdf->htf', h1b, wqkv_ref[3 * l + 2],
                       preferred_element_type=f32) + battn_ref[3 * l + 2]
        att = jnp.einsum('hqd,hkd->hqk', q, k,
                         preferred_element_type=f32) + bias        # (H, T, T)
        att = att - jnp.max(att, axis=-1, keepdims=True)
        e = jnp.exp(att)
        p = e * pl.reciprocal(jnp.sum(e, axis=-1, keepdims=True), approx=True)
        ctx = jnp.einsum('hqk,hkd->hqd', p, v,
                         preferred_element_type=f32)               # (H, T, hd)
        yh = jnp.einsum('htf,hfd->htd', ctx.astype(bf16), wp_ref[l],
                        preferred_element_type=f32)                # (H, T, D)
        x = x + jnp.sum(yh, axis=0) + vecd_ref[r + 4]              # + c_proj bias, residual

        # ---- MLP ----
        h2 = _ln(x, vecd_ref[r + 2], vecd_ref[r + 3])
        hf = jnp.dot(h2.astype(bf16), wf_ref[l],
                     preferred_element_type=f32) + vecw_ref[l]
        hf = _gelu(hf)
        hm = jnp.dot(hf.astype(bf16), wm_ref[l],
                     preferred_element_type=f32) + vecd_ref[r + 5]
        x = x + hm                                                 # residual

    # ---- final LN + lm_head (lane-dense padded output) ----
    x = _ln(x, vecd_ref[2 + 6 * num_layer], vecd_ref[3 + 6 * num_layer])
    out_ref[...] = jnp.dot(x.astype(bf16), wh_ref[...],
                           preferred_element_type=f32) + vecw_ref[num_layer]


# --------------------------- parameters / buffers ---------------------------

def make_rpe(nhead, maxlen):
    # RPE[h, q, k] = -max(q-k, 0) * 2**(-8/nhead * (h+1))  (matches the torch loop)
    qpos = jnp.arange(maxlen)[:, None]
    kpos = jnp.arange(maxlen)[None, :]
    dist = jnp.maximum(qpos - kpos, 0).astype(jnp.float32)
    slopes = 2.0 ** (-8.0 / nhead * jnp.arange(1, nhead + 1, dtype=jnp.float32))
    return -dist[None, :, :] * slopes[:, None, None]          # (H, maxlen, maxlen)


def make_pe(dmodel, maxlen):
    position = jnp.arange(maxlen, dtype=jnp.float32)[:, None]
    div_term = jnp.exp(jnp.arange(0, dmodel, 2, dtype=jnp.float32)
                       * -(math.log(10000.0) / dmodel))
    pe = jnp.zeros((maxlen, dmodel), jnp.float32)
    pe = pe.at[:, 0::2].set(jnp.sin(position * div_term))
    pe = pe.at[:, 1::2].set(jnp.cos(position * div_term))
    return pe


def _init_linear(key, fan_in, fan_out):
    kw, kb = jax.random.split(key)
    bound = 1.0 / math.sqrt(fan_in)
    W = jax.random.uniform(kw, (fan_in, fan_out), jnp.float32, -bound, bound)
    b = jax.random.uniform(kb, (fan_out,), jnp.float32, -bound, bound)
    return W, b


def init_params(key, *, vocab, dmodel, num_layer):
    keys = jax.random.split(key, 2 + num_layer)
    tok = 0.02 * jax.random.normal(keys[0], (vocab, dmodel), jnp.float32)
    tok = tok.at[0].set(0.0)                       # padding_idx=0
    params = {
        'tok_embed': tok,
        'emb_ln': (jnp.ones(dmodel), jnp.zeros(dmodel)),
        'ln_f': (jnp.ones(dmodel), jnp.zeros(dmodel)),
        'lm_head': _init_linear(keys[1], dmodel, vocab),
        'blocks': [],
    }
    for l in range(num_layer):
        k = jax.random.split(keys[2 + l], 4)
        params['blocks'].append(dict(
            ln1=(jnp.ones(dmodel), jnp.zeros(dmodel)),
            ln2=(jnp.ones(dmodel), jnp.zeros(dmodel)),
            c_attn=_init_linear(k[0], dmodel, 3 * dmodel),
            c_proj=_init_linear(k[1], dmodel, dmodel),
            c_fc=_init_linear(k[2], dmodel, 4 * dmodel),
            mlp_proj=_init_linear(k[3], 4 * dmodel, dmodel),
        ))
    return params


def pack_params(params, *, nhead, vocab, maxlen, use_rpe):
    """One-time host-side repacking of weights into a few kernel-friendly slabs."""
    tok = params['tok_embed']
    V, D = tok.shape
    assert D % nhead == 0
    hd = D // nhead
    L = len(params['blocks'])
    scale = 1.0 / math.sqrt(hd)
    assert vocab <= VPAD and vocab <= NPAD
    assert 4 * D == 128, "packed (L+1,128) bias slab assumes 4*dmodel == 128 == NPAD"

    bf16 = jnp.bfloat16
    tok_pad = jnp.zeros((VPAD, D), jnp.float32).at[:V].set(tok).astype(bf16)

    Wh, bh = params['lm_head']
    wh_pad = jnp.zeros((D, NPAD), jnp.float32).at[:, :vocab].set(Wh).astype(bf16)
    bh_pad = jnp.zeros((NPAD,), jnp.float32).at[:vocab].set(bh)

    eg, eb = params['emb_ln']
    rows_d = [eg, eb]
    rows_w = []
    wqkv, battn, wp, wf, wm = [], [], [], [], []
    for blk in params['blocks']:
        g1, b1 = blk['ln1']
        g2, b2 = blk['ln2']
        Wa, ba = blk['c_attn']
        Wp, bp = blk['c_proj']
        Wf, bfc = blk['c_fc']
        Wm, bm = blk['mlp_proj']
        rows_d += [g1, b1, g2, b2, bp, bm]
        rows_w += [bfc]
        # per-head q/k/v weights & biases; 1/sqrt(hd) folded into q (j == 0)
        for j, s in ((0, scale), (1, 1.0), (2, 1.0)):
            Wj = (Wa[:, j * D:(j + 1) * D] * s).reshape(D, nhead, hd).transpose(1, 0, 2)
            wqkv.append(Wj)                                         # (H, D, hd)
            battn.append((ba[j * D:(j + 1) * D] * s).reshape(nhead, 1, hd))
        wp.append(Wp.reshape(nhead, hd, D))                         # (H, hd, D)
        wf.append(Wf)
        wm.append(Wm)
    fg, fb = params['ln_f']
    rows_d += [fg, fb]
    rows_w += [bh_pad]

    buffers = dict(
        tok_pad=tok_pad,
        wh_pad=wh_pad,
        vecd=jnp.stack(rows_d).astype(jnp.float32),     # (4+6L, D)
        vecw=jnp.stack(rows_w).astype(jnp.float32),     # (L+1, 128)
        battn=jnp.stack(battn).astype(jnp.float32),     # (3L, H, 1, hd)
        wqkv=jnp.stack(wqkv).astype(bf16),              # (3L, H, D, hd)
        wp=jnp.stack(wp).astype(bf16),                  # (L, H, hd, D)
        wf=jnp.stack(wf).astype(bf16),                  # (L, D, 4D)
        wm=jnp.stack(wm).astype(bf16),                  # (L, 4D, D)
    )
    if use_rpe:
        buffers['rpe'] = make_rpe(nhead, maxlen)        # (H, maxlen, maxlen)
    else:
        buffers['pe'] = make_pe(D, maxlen)              # (maxlen, D)
    dims = dict(D=D, H=nhead, hd=hd, L=L, vocab=vocab)
    return buffers, dims


# ------------------------------- forward pass -------------------------------

def _full_spec(shape):
    nd = len(shape)
    return pl.BlockSpec(tuple(shape), lambda b, _nd=nd: (0,) * _nd)


def gpt_forward(buffers, idx, *, dims, use_rpe):
    D, H, hd, L, vocab = dims['D'], dims['H'], dims['hd'], dims['L'], dims['vocab']
    B, T = idx.shape
    M = B * T

    # per-batch additive attention bias (H, T, T): causal (+ RPE)
    row = jnp.arange(T)[:, None]
    col = jnp.arange(T)[None, :]
    bias = jnp.where(row >= col, 0.0, NEG_BIG).astype(jnp.float32)[None]
    bias = jnp.broadcast_to(bias, (H, T, T))
    if use_rpe:
        bias = bias + buffers['rpe'][:, :T, :T]

    # host-side one-hot (exact, tiny); gather itself stays fused in the kernel
    onehot = (idx.reshape(M, 1) == jnp.arange(VPAD)[None, :]).astype(jnp.float32)

    inputs = [onehot, buffers['tok_pad']]
    in_specs = [pl.BlockSpec((T, VPAD), lambda b: (b, 0)),
                _full_spec(buffers['tok_pad'].shape)]
    if not use_rpe:
        pe = buffers['pe'][:T]
        inputs.append(pe)
        in_specs.append(_full_spec(pe.shape))
    rest = [bias, buffers['vecd'], buffers['vecw'], buffers['battn'],
            buffers['wqkv'], buffers['wp'], buffers['wf'], buffers['wm'],
            buffers['wh_pad']]
    inputs += rest
    in_specs += [_full_spec(a.shape) for a in rest]

    kernel = functools.partial(_gpt_kernel, T=T, D=D, H=H, hd=hd,
                               num_layer=L, use_rpe=use_rpe)

    # TODO(synk): for large dmodel/num_layer, stream per-layer weights via a
    # grid axis / pltpu.emit_pipeline instead of keeping all layers resident
    # (matters first on v7x's 64 MiB VMEM).
    logits_pad = pl.pallas_call(
        kernel,
        out_shape=jax.ShapeDtypeStruct((M, NPAD), jnp.float32),
        grid=(B,),
        in_specs=in_specs,
        out_specs=pl.BlockSpec((T, NPAD), lambda b: (b, 0)),
        compiler_params=pltpu.CompilerParams(
            dimension_semantics=("parallel",),
            vmem_limit_bytes=32 * 1024 * 1024),
    )(*inputs)

    return logits_pad[:, :vocab].reshape(B, T, vocab)


# ---------------------------------- main ----------------------------------

if __name__ == "__main__":
    # Config consistent with GPT(args): dmodel=32, head=4, maxlen=8, vocab=50,
    # num_layer=2, drop=0.0, rpe=True.
    B, T = 2, 8
    dmodel, nhead, maxlen, vocab, num_layer = 32, 4, 8, 50, 2
    use_rpe = True

    key = jax.random.PRNGKey(0)
    kp, ki = jax.random.split(key)
    params = init_params(kp, vocab=vocab, dmodel=dmodel, num_layer=num_layer)
    buffers, dims = pack_params(params, nhead=nhead, vocab=vocab,
                                maxlen=maxlen, use_rpe=use_rpe)

    idx = jax.random.randint(ki, (B, T), 0, vocab, dtype=jnp.int32)

    fwd = jax.jit(functools.partial(gpt_forward, dims=dims, use_rpe=use_rpe))
    logits = fwd(buffers, idx)
    jax.block_until_ready(logits)

    assert logits.shape == (B, T, vocab), logits.shape
    assert bool(jnp.all(jnp.isfinite(logits)))
    print("KERNEL_OK")
</pallas_src>

<mosaic_0001>
module attributes {stable_mosaic.version = 11 : i64} {
  func.func @_gpt_kernel(%arg0: i32, %arg1: memref<8x128xf32, #tpu.memory_space<vmem>>, %arg2: memref<128x32xbf16, #tpu.memory_space<vmem>>, %arg3: memref<4x8x8xf32, #tpu.memory_space<vmem>>, %arg4: memref<16x32xf32, #tpu.memory_space<vmem>>, %arg5: memref<3x128xf32, #tpu.memory_space<vmem>>, %arg6: memref<6x4x1x8xf32, #tpu.memory_space<vmem>>, %arg7: memref<6x4x32x8xbf16, #tpu.memory_space<vmem>>, %arg8: memref<2x4x8x32xbf16, #tpu.memory_space<vmem>>, %arg9: memref<2x32x128xbf16, #tpu.memory_space<vmem>>, %arg10: memref<2x128x32xbf16, #tpu.memory_space<vmem>>, %arg11: memref<32x128xbf16, #tpu.memory_space<vmem>>, %arg12: memref<8x128xf32, #tpu.memory_space<vmem>>) attributes {dimension_semantics = [#tpu.dimension_semantics<parallel>], iteration_bounds = array<i64: 2>, scalar_prefetch = 0 : i64, scratch_operands = 0 : i64, tpu.core_type = #tpu.core_type<tc>, window_params = [{transform_indices = @transform_0, window_bounds = array<i64: 8, 128>}, {pipeline_mode = #tpu.pipeline_mode<synchronous>, transform_indices = @transform_1, window_bounds = array<i64: 128, 32>}, {pipeline_mode = #tpu.pipeline_mode<synchronous>, transform_indices = @transform_2, window_bounds = array<i64: 4, 8, 8>}, {pipeline_mode = #tpu.pipeline_mode<synchronous>, transform_indices = @transform_3, window_bounds = array<i64: 16, 32>}, {pipeline_mode = #tpu.pipeline_mode<synchronous>, transform_indices = @transform_4, window_bounds = array<i64: 3, 128>}, {pipeline_mode = #tpu.pipeline_mode<synchronous>, transform_indices = @transform_5, window_bounds = array<i64: 6, 4, 1, 8>}, {pipeline_mode = #tpu.pipeline_mode<synchronous>, transform_indices = @transform_6, window_bounds = array<i64: 6, 4, 32, 8>}, {pipeline_mode = #tpu.pipeline_mode<synchronous>, transform_indices = @transform_7, window_bounds = array<i64: 2, 4, 8, 32>}, {pipeline_mode = #tpu.pipeline_mode<synchronous>, transform_indices = @transform_8, window_bounds = array<i64: 2, 32, 128>}, {pipeline_mode = #tpu.pipeline_mode<synchronous>, transform_indices = @transform_9, window_bounds = array<i64: 2, 128, 32>}, {pipeline_mode = #tpu.pipeline_mode<synchronous>, transform_indices = @transform_10, window_bounds = array<i64: 32, 128>}, {transform_indices = @transform_11, window_bounds = array<i64: 8, 128>}]} {
    %c0 = arith.constant 0 : index
    %c0_0 = arith.constant 0 : index
    %0 = vector.load %arg1[%c0, %c0_0] : memref<8x128xf32, #tpu.memory_space<vmem>>, vector<8x128xf32>
    %1 = arith.truncf %0 : vector<8x128xf32> to vector<8x128xbf16>
    %c0_1 = arith.constant 0 : index
    %c0_2 = arith.constant 0 : index
    %2 = vector.load %arg2[%c0_1, %c0_2] : memref<128x32xbf16, #tpu.memory_space<vmem>>, vector<128x32xbf16>
    %cst = arith.constant dense<0.000000e+00> : vector<8x32xf32>
    %3 = tpu.matmul %1, %2, %cst {dimension_numbers = #tpu.dot_dimension_numbers<[1], [0], [0], [1], [0, 0, 1, 1], [], []>} : vector<8x128xbf16>, vector<128x32xbf16>, vector<8x32xf32> -> vector<8x32xf32>
    %c0_3 = arith.constant 0 : index
    %c0_4 = arith.constant 0 : index
    %4 = vector.load %arg4[%c0_3, %c0_4] : memref<16x32xf32, #tpu.memory_space<vmem>>, vector<1x32xf32>
    %5 = vector.shape_cast %4 : vector<1x32xf32> to vector<32xf32>
    %c1 = arith.constant 1 : index
    %c0_5 = arith.constant 0 : index
    %6 = vector.load %arg4[%c1, %c0_5] : memref<16x32xf32, #tpu.memory_space<vmem>>, vector<1x32xf32>
    %7 = vector.shape_cast %6 : vector<1x32xf32> to vector<32xf32>
    %cst_6 = arith.constant dense<0.000000e+00> : vector<8xf32>
    %8 = vector.multi_reduction <add>, %3, %cst_6 [1] : vector<8x32xf32> to vector<8xf32>
    %9 = vector.shape_cast %8 : vector<8xf32> to vector<8x1xf32>
    %cst_7 = arith.constant 3.200000e+01 : f32
    %10 = vector.broadcast %cst_7 : f32 to vector<8x1xf32>
    %11 = arith.divf %9, %10 : vector<8x1xf32>
    %12 = vector.broadcast %11 : vector<8x1xf32> to vector<8x32xf32>
    %13 = arith.subf %3, %12 : vector<8x32xf32>
    %14 = arith.mulf %13, %13 : vector<8x32xf32>
    %cst_8 = arith.constant dense<0.000000e+00> : vector<8xf32>
    %15 = vector.multi_reduction <add>, %14, %cst_8 [1] : vector<8x32xf32> to vector<8xf32>
    %16 = vector.shape_cast %15 : vector<8xf32> to vector<8x1xf32>
    %cst_9 = arith.constant 3.200000e+01 : f32
    %17 = vector.broadcast %cst_9 : f32 to vector<8x1xf32>
    %18 = arith.divf %16, %17 : vector<8x1xf32>
    %19 = vector.broadcast %11 : vector<8x1xf32> to vector<8x32xf32>
    %20 = arith.subf %3, %19 : vector<8x32xf32>
    %cst_10 = arith.constant 9.99999974E-6 : f32
    %21 = vector.broadcast %cst_10 : f32 to vector<8x1xf32>
    %22 = arith.addf %18, %21 : vector<8x1xf32>
    %23 = math.rsqrt %22 : vector<8x1xf32>
    %24 = vector.broadcast %23 : vector<8x1xf32> to vector<8x32xf32>
    %25 = arith.mulf %20, %24 : vector<8x32xf32>
    %26 = vector.shape_cast %5 : vector<32xf32> to vector<1x32xf32>
    %27 = vector.broadcast %26 : vector<1x32xf32> to vector<8x32xf32>
    %28 = arith.mulf %25, %27 : vector<8x32xf32>
    %29 = vector.shape_cast %7 : vector<32xf32> to vector<1x32xf32>
    %30 = vector.broadcast %29 : vector<1x32xf32> to vector<8x32xf32>
    %31 = arith.addf %28, %30 : vector<8x32xf32>
    %c0_11 = arith.constant 0 : index
    %c0_12 = arith.constant 0 : index
    %c0_13 = arith.constant 0 : index
    %32 = vector.load %arg3[%c0_11, %c0_12, %c0_13] : memref<4x8x8xf32, #tpu.memory_space<vmem>>, vector<4x8x8xf32>
    %c2 = arith.constant 2 : index
    %c0_14 = arith.constant 0 : index
    %33 = vector.load %arg4[%c2, %c0_14] : memref<16x32xf32, #tpu.memory_space<vmem>>, vector<1x32xf32>
    %34 = vector.shape_cast %33 : vector<1x32xf32> to vector<32xf32>
    %c3 = arith.constant 3 : index
    %c0_15 = arith.constant 0 : index
    %35 = vector.load %arg4[%c3, %c0_15] : memref<16x32xf32, #tpu.memory_space<vmem>>, vector<1x32xf32>
    %36 = vector.shape_cast %35 : vector<1x32xf32> to vector<32xf32>
    %cst_16 = arith.constant dense<0.000000e+00> : vector<8xf32>
    %37 = vector.multi_reduction <add>, %31, %cst_16 [1] : vector<8x32xf32> to vector<8xf32>
    %38 = vector.shape_cast %37 : vector<8xf32> to vector<8x1xf32>
    %cst_17 = arith.constant 3.200000e+01 : f32
    %39 = vector.broadcast %cst_17 : f32 to vector<8x1xf32>
    %40 = arith.divf %38, %39 : vector<8x1xf32>
    %41 = vector.broadcast %40 : vector<8x1xf32> to vector<8x32xf32>
    %42 = arith.subf %31, %41 : vector<8x32xf32>
    %43 = arith.mulf %42, %42 : vector<8x32xf32>
    %cst_18 = arith.constant dense<0.000000e+00> : vector<8xf32>
    %44 = vector.multi_reduction <add>, %43, %cst_18 [1] : vector<8x32xf32> to vector<8xf32>
    %45 = vector.shape_cast %44 : vector<8xf32> to vector<8x1xf32>
    %cst_19 = arith.constant 3.200000e+01 : f32
    %46 = vector.broadcast %cst_19 : f32 to vector<8x1xf32>
    %47 = arith.divf %45, %46 : vector<8x1xf32>
    %48 = vector.broadcast %40 : vector<8x1xf32> to vector<8x32xf32>
    %49 = arith.subf %31, %48 : vector<8x32xf32>
    %cst_20 = arith.constant 9.99999974E-6 : f32
    %50 = vector.broadcast %cst_20 : f32 to vector<8x1xf32>
    %51 = arith.addf %47, %50 : vector<8x1xf32>
    %52 = math.rsqrt %51 : vector<8x1xf32>
    %53 = vector.broadcast %52 : vector<8x1xf32> to vector<8x32xf32>
    %54 = arith.mulf %49, %53 : vector<8x32xf32>
    %55 = vector.shape_cast %34 : vector<32xf32> to vector<1x32xf32>
    %56 = vector.broadcast %55 : vector<1x32xf32> to vector<8x32xf32>
    %57 = arith.mulf %54, %56 : vector<8x32xf32>
    %58 = vector.shape_cast %36 : vector<32xf32> to vector<1x32xf32>
    %59 = vector.broadcast %58 : vector<1x32xf32> to vector<8x32xf32>
    %60 = arith.addf %57, %59 : vector<8x32xf32>
    %61 = arith.truncf %60 : vector<8x32xf32> to vector<8x32xbf16>
    %62 = vector.shape_cast %61 : vector<8x32xbf16> to vector<1x8x32xbf16>
    %63 = vector.shape_cast %62 : vector<1x8x32xbf16> to vector<1x8x32xbf16>
    %64 = vector.broadcast %63 : vector<1x8x32xbf16> to vector<4x8x32xbf16>
    %c0_21 = arith.constant 0 : index
    %c0_22 = arith.constant 0 : index
    %c0_23 = arith.constant 0 : index
    %c0_24 = arith.constant 0 : index
    %65 = vector.load %arg7[%c0_21, %c0_22, %c0_23, %c0_24] : memref<6x4x32x8xbf16, #tpu.memory_space<vmem>>, vector<1x4x32x8xbf16>
    %66 = vector.shape_cast %65 : vector<1x4x32x8xbf16> to vector<4x32x8xbf16>
    "tpu.trace_start"() <{level = 10 : i32, message = "htd,hdf->htf"}> : () -> ()
    %cst_25 = arith.constant dense<0.000000e+00> : vector<4x8x8xf32>
    %67 = tpu.matmul %64, %66, %cst_25 {dimension_numbers = #tpu.dot_dimension_numbers<[2], [1], [1], [2], [0, 0, 0, 1, 1, 2], [0], [0]>} : vector<4x8x32xbf16>, vector<4x32x8xbf16>, vector<4x8x8xf32> -> vector<4x8x8xf32>
    "tpu.trace_stop"() : () -> ()
    %c0_26 = arith.constant 0 : index
    %c0_27 = arith.constant 0 : index
    %c0_28 = arith.constant 0 : index
    %c0_29 = arith.constant 0 : index
    %68 = vector.load %arg6[%c0_26, %c0_27, %c0_28, %c0_29] : memref<6x4x1x8xf32, #tpu.memory_space<vmem>>, vector<1x4x1x8xf32>
    %69 = vector.shape_cast %68 : vector<1x4x1x8xf32> to vector<4x1x8xf32>
    %70 = vector.broadcast %69 : vector<4x1x8xf32> to vector<4x8x8xf32>
    %71 = arith.addf %67, %70 : vector<4x8x8xf32>
    %c1_30 = arith.constant 1 : index
    %c0_31 = arith.constant 0 : index
    %c0_32 = arith.constant 0 : index
    %c0_33 = arith.constant 0 : index
    %72 = vector.load %arg7[%c1_30, %c0_31, %c0_32, %c0_33] : memref<6x4x32x8xbf16, #tpu.memory_space<vmem>>, vector<1x4x32x8xbf16>
    %73 = vector.shape_cast %72 : vector<1x4x32x8xbf16> to vector<4x32x8xbf16>
    "tpu.trace_start"() <{level = 10 : i32, message = "htd,hdf->htf"}> : () -> ()
    %cst_34 = arith.constant dense<0.000000e+00> : vector<4x8x8xf32>
    %74 = tpu.matmul %64, %73, %cst_34 {dimension_numbers = #tpu.dot_dimension_numbers<[2], [1], [1], [2], [0, 0, 0, 1, 1, 2], [0], [0]>} : vector<4x8x32xbf16>, vector<4x32x8xbf16>, vector<4x8x8xf32> -> vector<4x8x8xf32>
    "tpu.trace_stop"() : () -> ()
    %c1_35 = arith.constant 1 : index
    %c0_36 = arith.constant 0 : index
    %c0_37 = arith.constant 0 : index
    %c0_38 = arith.constant 0 : index
    %75 = vector.load %arg6[%c1_35, %c0_36, %c0_37, %c0_38] : memref<6x4x1x8xf32, #tpu.memory_space<vmem>>, vector<1x4x1x8xf32>
    %76 = vector.shape_cast %75 : vector<1x4x1x8xf32> to vector<4x1x8xf32>
    %77 = vector.broadcast %76 : vector<4x1x8xf32> to vector<4x8x8xf32>
    %78 = arith.addf %74, %77 : vector<4x8x8xf32>
    %c2_39 = arith.constant 2 : index
    %c0_40 = arith.constant 0 : index
    %c0_41 = arith.constant 0 : index
    %c0_42 = arith.constant 0 : index
    %79 = vector.load %arg7[%c2_39, %c0_40, %c0_41, %c0_42] : memref<6x4x32x8xbf16, #tpu.memory_space<vmem>>, vector<1x4x32x8xbf16>
    %80 = vector.shape_cast %79 : vector<1x4x32x8xbf16> to vector<4x32x8xbf16>
    "tpu.trace_start"() <{level = 10 : i32, message = "htd,hdf->htf"}> : () -> ()
    %cst_43 = arith.constant dense<0.000000e+00> : vector<4x8x8xf32>
    %81 = tpu.matmul %64, %80, %cst_43 {dimension_numbers = #tpu.dot_dimension_numbers<[2], [1], [1], [2], [0, 0, 0, 1, 1, 2], [0], [0]>} : vector<4x8x32xbf16>, vector<4x32x8xbf16>, vector<4x8x8xf32> -> vector<4x8x8xf32>
    "tpu.trace_stop"() : () -> ()
    %c2_44 = arith.constant 2 : index
    %c0_45 = arith.constant 0 : index
    %c0_46 = arith.constant 0 : index
    %c0_47 = arith.constant 0 : index
    %82 = vector.load %arg6[%c2_44, %c0_45, %c0_46, %c0_47] : memref<6x4x1x8xf32, #tpu.memory_space<vmem>>, vector<1x4x1x8xf32>
    %83 = vector.shape_cast %82 : vector<1x4x1x8xf32> to vector<4x1x8xf32>
    %84 = vector.broadcast %83 : vector<4x1x8xf32> to vector<4x8x8xf32>
    %85 = arith.addf %81, %84 : vector<4x8x8xf32>
    "tpu.trace_start"() <{level = 10 : i32, message = "hqd,hkd->hqk"}> : () -> ()
    %cst_48 = arith.constant dense<0.000000e+00> : vector<4x8x8xf32>
    %86 = tpu.matmul %71, %78, %cst_48 {dimension_numbers = #tpu.dot_dimension_numbers<[2], [2], [1], [1], [0, 0, 0, 1, 1, 1], [0], [0]>} : vector<4x8x8xf32>, vector<4x8x8xf32>, vector<4x8x8xf32> -> vector<4x8x8xf32>
    "tpu.trace_stop"() : () -> ()
    %87 = arith.addf %86, %32 : vector<4x8x8xf32>
    %cst_49 = arith.constant dense<0xFF800000> : vector<4x8xf32>
    %88 = vector.multi_reduction <maximumf>, %87, %cst_49 [2] : vector<4x8x8xf32> to vector<4x8xf32>
    %89 = vector.shape_cast %88 : vector<4x8xf32> to vector<4x8x1xf32>
    %90 = vector.broadcast %89 : vector<4x8x1xf32> to vector<4x8x8xf32>
    %91 = arith.subf %87, %90 : vector<4x8x8xf32>
    %92 = math.exp %91 : vector<4x8x8xf32>
    %cst_50 = arith.constant dense<0.000000e+00> : vector<4x8xf32>
    %93 = vector.multi_reduction <add>, %92, %cst_50 [2] : vector<4x8x8xf32> to vector<4x8xf32>
    %94 = vector.shape_cast %93 : vector<4x8xf32> to vector<4x8x1xf32>
    %95 = tpu.reciprocal %94 {approx = true} : vector<4x8x1xf32> -> vector<4x8x1xf32>
    %96 = vector.broadcast %95 : vector<4x8x1xf32> to vector<4x8x8xf32>
    %97 = arith.mulf %92, %96 : vector<4x8x8xf32>
    "tpu.trace_start"() <{level = 10 : i32, message = "hqk,hkd->hqd"}> : () -> ()
    %cst_51 = arith.constant dense<0.000000e+00> : vector<4x8x8xf32>
    %98 = tpu.matmul %97, %85, %cst_51 {dimension_numbers = #tpu.dot_dimension_numbers<[2], [1], [1], [2], [0, 0, 0, 1, 1, 2], [0], [0]>} : vector<4x8x8xf32>, vector<4x8x8xf32>, vector<4x8x8xf32> -> vector<4x8x8xf32>
    "tpu.trace_stop"() : () -> ()
    %99 = arith.truncf %98 : vector<4x8x8xf32> to vector<4x8x8xbf16>
    %c0_52 = arith.constant 0 : index
    %c0_53 = arith.constant 0 : index
    %c0_54 = arith.constant 0 : index
    %c0_55 = arith.constant 0 : index
    %100 = vector.load %arg8[%c0_52, %c0_53, %c0_54, %c0_55] : memref<2x4x8x32xbf16, #tpu.memory_space<vmem>>, vector<1x4x8x32xbf16>
    %101 = vector.shape_cast %100 : vector<1x4x8x32xbf16> to vector<4x8x32xbf16>
    "tpu.trace_start"() <{level = 10 : i32, message = "htf,hfd->htd"}> : () -> ()
    %cst_56 = arith.constant dense<0.000000e+00> : vector<4x8x32xf32>
    %102 = tpu.matmul %99, %101, %cst_56 {dimension_numbers = #tpu.dot_dimension_numbers<[2], [1], [1], [2], [0, 0, 0, 1, 1, 2], [0], [0]>} : vector<4x8x8xbf16>, vector<4x8x32xbf16>, vector<4x8x32xf32> -> vector<4x8x32xf32>
    "tpu.trace_stop"() : () -> ()
    %cst_57 = arith.constant dense<0.000000e+00> : vector<8x32xf32>
    %103 = vector.multi_reduction <add>, %102, %cst_57 [0] : vector<4x8x32xf32> to vector<8x32xf32>
    %104 = arith.addf %31, %103 : vector<8x32xf32>
    %c6 = arith.constant 6 : index
    %c0_58 = arith.constant 0 : index
    %105 = vector.load %arg4[%c6, %c0_58] : memref<16x32xf32, #tpu.memory_space<vmem>>, vector<1x32xf32>
    %106 = vector.shape_cast %105 : vector<1x32xf32> to vector<32xf32>
    %107 = vector.shape_cast %106 : vector<32xf32> to vector<1x32xf32>
    %108 = vector.broadcast %107 : vector<1x32xf32> to vector<8x32xf32>
    %109 = arith.addf %104, %108 : vector<8x32xf32>
    %c4 = arith.constant 4 : index
    %c0_59 = arith.constant 0 : index
    %110 = vector.load %arg4[%c4, %c0_59] : memref<16x32xf32, #tpu.memory_space<vmem>>, vector<1x32xf32>
    %111 = vector.shape_cast %110 : vector<1x32xf32> to vector<32xf32>
    %c5 = arith.constant 5 : index
    %c0_60 = arith.constant 0 : index
    %112 = vector.load %arg4[%c5, %c0_60] : memref<16x32xf32, #tpu.memory_space<vmem>>, vector<1x32xf32>
    %113 = vector.shape_cast %112 : vector<1x32xf32> to vector<32xf32>
    %cst_61 = arith.constant dense<0.000000e+00> : vector<8xf32>
    %114 = vector.multi_reduction <add>, %109, %cst_61 [1] : vector<8x32xf32> to vector<8xf32>
    %115 = vector.shape_cast %114 : vector<8xf32> to vector<8x1xf32>
    %cst_62 = arith.constant 3.200000e+01 : f32
    %116 = vector.broadcast %cst_62 : f32 to vector<8x1xf32>
    %117 = arith.divf %115, %116 : vector<8x1xf32>
    %118 = vector.broadcast %117 : vector<8x1xf32> to vector<8x32xf32>
    %119 = arith.subf %109, %118 : vector<8x32xf32>
    %120 = arith.mulf %119, %119 : vector<8x32xf32>
    %cst_63 = arith.constant dense<0.000000e+00> : vector<8xf32>
    %121 = vector.multi_reduction <add>, %120, %cst_63 [1] : vector<8x32xf32> to vector<8xf32>
    %122 = vector.shape_cast %121 : vector<8xf32> to vector<8x1xf32>
    %cst_64 = arith.constant 3.200000e+01 : f32
    %123 = vector.broadcast %cst_64 : f32 to vector<8x1xf32>
    %124 = arith.divf %122, %123 : vector<8x1xf32>
    %125 = vector.broadcast %117 : vector<8x1xf32> to vector<8x32xf32>
    %126 = arith.subf %109, %125 : vector<8x32xf32>
    %cst_65 = arith.constant 9.99999974E-6 : f32
    %127 = vector.broadcast %cst_65 : f32 to vector<8x1xf32>
    %128 = arith.addf %124, %127 : vector<8x1xf32>
    %129 = math.rsqrt %128 : vector<8x1xf32>
    %130 = vector.broadcast %129 : vector<8x1xf32> to vector<8x32xf32>
    %131 = arith.mulf %126, %130 : vector<8x32xf32>
    %132 = vector.shape_cast %111 : vector<32xf32> to vector<1x32xf32>
    %133 = vector.broadcast %132 : vector<1x32xf32> to vector<8x32xf32>
    %134 = arith.mulf %131, %133 : vector<8x32xf32>
    %135 = vector.shape_cast %113 : vector<32xf32> to vector<1x32xf32>
    %136 = vector.broadcast %135 : vector<1x32xf32> to vector<8x32xf32>
    %137 = arith.addf %134, %136 : vector<8x32xf32>
    %138 = arith.truncf %137 : vector<8x32xf32> to vector<8x32xbf16>
    %c0_66 = arith.constant 0 : index
    %c0_67 = arith.constant 0 : index
    %c0_68 = arith.constant 0 : index
    %139 = vector.load %arg9[%c0_66, %c0_67, %c0_68] : memref<2x32x128xbf16, #tpu.memory_space<vmem>>, vector<1x32x128xbf16>
    %140 = vector.shape_cast %139 : vector<1x32x128xbf16> to vector<32x128xbf16>
    %cst_69 = arith.constant dense<0.000000e+00> : vector<8x128xf32>
    %141 = tpu.matmul %138, %140, %cst_69 {dimension_numbers = #tpu.dot_dimension_numbers<[1], [0], [0], [1], [0, 0, 1, 1], [], []>} : vector<8x32xbf16>, vector<32x128xbf16>, vector<8x128xf32> -> vector<8x128xf32>
    %c0_70 = arith.constant 0 : index
    %c0_71 = arith.constant 0 : index
    %142 = vector.load %arg5[%c0_70, %c0_71] : memref<3x128xf32, #tpu.memory_space<vmem>>, vector<1x128xf32>
    %143 = vector.shape_cast %142 : vector<1x128xf32> to vector<128xf32>
    %144 = vector.shape_cast %143 : vector<128xf32> to vector<1x128xf32>
    %145 = vector.broadcast %144 : vector<1x128xf32> to vector<8x128xf32>
    %146 = arith.addf %141, %145 : vector<8x128xf32>
    %cst_72 = arith.constant 5.000000e-01 : f32
    %147 = vector.broadcast %cst_72 : f32 to vector<8x128xf32>
    %148 = arith.mulf %147, %146 : vector<8x128xf32>
    %149 = arith.mulf %146, %146 : vector<8x128xf32>
    %150 = arith.mulf %146, %149 : vector<8x128xf32>
    %cst_73 = arith.constant 4.471500e-02 : f32
    %151 = vector.broadcast %cst_73 : f32 to vector<8x128xf32>
    %152 = arith.mulf %151, %150 : vector<8x128xf32>
    %153 = arith.addf %146, %152 : vector<8x128xf32>
    %cst_74 = arith.constant 0.797884583 : f32
    %154 = vector.broadcast %cst_74 : f32 to vector<8x128xf32>
    %155 = arith.mulf %154, %153 : vector<8x128xf32>
    %156 = math.tanh %155 : vector<8x128xf32>
    %cst_75 = arith.constant 1.000000e+00 : f32
    %157 = vector.broadcast %cst_75 : f32 to vector<8x128xf32>
    %158 = arith.addf %157, %156 : vector<8x128xf32>
    %159 = arith.mulf %148, %158 : vector<8x128xf32>
    %160 = arith.truncf %159 : vector<8x128xf32> to vector<8x128xbf16>
    %c0_76 = arith.constant 0 : index
    %c0_77 = arith.constant 0 : index
    %c0_78 = arith.constant 0 : index
    %161 = vector.load %arg10[%c0_76, %c0_77, %c0_78] : memref<2x128x32xbf16, #tpu.memory_space<vmem>>, vector<1x128x32xbf16>
    %162 = vector.shape_cast %161 : vector<1x128x32xbf16> to vector<128x32xbf16>
    %cst_79 = arith.constant dense<0.000000e+00> : vector<8x32xf32>
    %163 = tpu.matmul %160, %162, %cst_79 {dimension_numbers = #tpu.dot_dimension_numbers<[1], [0], [0], [1], [0, 0, 1, 1], [], []>} : vector<8x128xbf16>, vector<128x32xbf16>, vector<8x32xf32> -> vector<8x32xf32>
    %c7 = arith.constant 7 : index
    %c0_80 = arith.constant 0 : index
    %164 = vector.load %arg4[%c7, %c0_80] : memref<16x32xf32, #tpu.memory_space<vmem>>, vector<1x32xf32>
    %165 = vector.shape_cast %164 : vector<1x32xf32> to vector<32xf32>
    %166 = vector.shape_cast %165 : vector<32xf32> to vector<1x32xf32>
    %167 = vector.broadcast %166 : vector<1x32xf32> to vector<8x32xf32>
    %168 = arith.addf %163, %167 : vector<8x32xf32>
    %169 = arith.addf %109, %168 : vector<8x32xf32>
    %c8 = arith.constant 8 : index
    %c0_81 = arith.constant 0 : index
    %170 = vector.load %arg4[%c8, %c0_81] : memref<16x32xf32, #tpu.memory_space<vmem>>, vector<1x32xf32>
    %171 = vector.shape_cast %170 : vector<1x32xf32> to vector<32xf32>
    %c9 = arith.constant 9 : index
    %c0_82 = arith.constant 0 : index
    %172 = vector.load %arg4[%c9, %c0_82] : memref<16x32xf32, #tpu.memory_space<vmem>>, vector<1x32xf32>
    %173 = vector.shape_cast %172 : vector<1x32xf32> to vector<32xf32>
    %cst_83 = arith.constant dense<0.000000e+00> : vector<8xf32>
    %174 = vector.multi_reduction <add>, %169, %cst_83 [1] : vector<8x32xf32> to vector<8xf32>
    %175 = vector.shape_cast %174 : vector<8xf32> to vector<8x1xf32>
    %cst_84 = arith.constant 3.200000e+01 : f32
    %176 = vector.broadcast %cst_84 : f32 to vector<8x1xf32>
    %177 = arith.divf %175, %176 : vector<8x1xf32>
    %178 = vector.broadcast %177 : vector<8x1xf32> to vector<8x32xf32>
    %179 = arith.subf %169, %178 : vector<8x32xf32>
    %180 = arith.mulf %179, %179 : vector<8x32xf32>
    %cst_85 = arith.constant dense<0.000000e+00> : vector<8xf32>
    %181 = vector.multi_reduction <add>, %180, %cst_85 [1] : vector<8x32xf32> to vector<8xf32>
    %182 = vector.shape_cast %181 : vector<8xf32> to vector<8x1xf32>
    %cst_86 = arith.constant 3.200000e+01 : f32
    %183 = vector.broadcast %cst_86 : f32 to vector<8x1xf32>
    %184 = arith.divf %182, %183 : vector<8x1xf32>
    %185 = vector.broadcast %177 : vector<8x1xf32> to vector<8x32xf32>
    %186 = arith.subf %169, %185 : vector<8x32xf32>
    %cst_87 = arith.constant 9.99999974E-6 : f32
    %187 = vector.broadcast %cst_87 : f32 to vector<8x1xf32>
    %188 = arith.addf %184, %187 : vector<8x1xf32>
    %189 = math.rsqrt %188 : vector<8x1xf32>
    %190 = vector.broadcast %189 : vector<8x1xf32> to vector<8x32xf32>
    %191 = arith.mulf %186, %190 : vector<8x32xf32>
    %192 = vector.shape_cast %171 : vector<32xf32> to vector<1x32xf32>
    %193 = vector.broadcast %192 : vector<1x32xf32> to vector<8x32xf32>
    %194 = arith.mulf %191, %193 : vector<8x32xf32>
    %195 = vector.shape_cast %173 : vector<32xf32> to vector<1x32xf32>
    %196 = vector.broadcast %195 : vector<1x32xf32> to vector<8x32xf32>
    %197 = arith.addf %194, %196 : vector<8x32xf32>
    %198 = arith.truncf %197 : vector<8x32xf32> to vector<8x32xbf16>
    %199 = vector.shape_cast %198 : vector<8x32xbf16> to vector<1x8x32xbf16>
    %200 = vector.shape_cast %199 : vector<1x8x32xbf16> to vector<1x8x32xbf16>
    %201 = vector.broadcast %200 : vector<1x8x32xbf16> to vector<4x8x32xbf16>
    %c3_88 = arith.constant 3 : index
    %c0_89 = arith.constant 0 : index
    %c0_90 = arith.constant 0 : index
    %c0_91 = arith.constant 0 : index
    %202 = vector.load %arg7[%c3_88, %c0_89, %c0_90, %c0_91] : memref<6x4x32x8xbf16, #tpu.memory_space<vmem>>, vector<1x4x32x8xbf16>
    %203 = vector.shape_cast %202 : vector<1x4x32x8xbf16> to vector<4x32x8xbf16>
    "tpu.trace_start"() <{level = 10 : i32, message = "htd,hdf->htf"}> : () -> ()
    %cst_92 = arith.constant dense<0.000000e+00> : vector<4x8x8xf32>
    %204 = tpu.matmul %201, %203, %cst_92 {dimension_numbers = #tpu.dot_dimension_numbers<[2], [1], [1], [2], [0, 0, 0, 1, 1, 2], [0], [0]>} : vector<4x8x32xbf16>, vector<4x32x8xbf16>, vector<4x8x8xf32> -> vector<4x8x8xf32>
    "tpu.trace_stop"() : () -> ()
    %c3_93 = arith.constant 3 : index
    %c0_94 = arith.constant 0 : index
    %c0_95 = arith.constant 0 : index
    %c0_96 = arith.constant 0 : index
    %205 = vector.load %arg6[%c3_93, %c0_94, %c0_95, %c0_96] : memref<6x4x1x8xf32, #tpu.memory_space<vmem>>, vector<1x4x1x8xf32>
    %206 = vector.shape_cast %205 : vector<1x4x1x8xf32> to vector<4x1x8xf32>
    %207 = vector.broadcast %206 : vector<4x1x8xf32> to vector<4x8x8xf32>
    %208 = arith.addf %204, %207 : vector<4x8x8xf32>
    %c4_97 = arith.constant 4 : index
    %c0_98 = arith.constant 0 : index
    %c0_99 = arith.constant 0 : index
    %c0_100 = arith.constant 0 : index
    %209 = vector.load %arg7[%c4_97, %c0_98, %c0_99, %c0_100] : memref<6x4x32x8xbf16, #tpu.memory_space<vmem>>, vector<1x4x32x8xbf16>
    %210 = vector.shape_cast %209 : vector<1x4x32x8xbf16> to vector<4x32x8xbf16>
    "tpu.trace_start"() <{level = 10 : i32, message = "htd,hdf->htf"}> : () -> ()
    %cst_101 = arith.constant dense<0.000000e+00> : vector<4x8x8xf32>
    %211 = tpu.matmul %201, %210, %cst_101 {dimension_numbers = #tpu.dot_dimension_numbers<[2], [1], [1], [2], [0, 0, 0, 1, 1, 2], [0], [0]>} : vector<4x8x32xbf16>, vector<4x32x8xbf16>, vector<4x8x8xf32> -> vector<4x8x8xf32>
    "tpu.trace_stop"() : () -> ()
    %c4_102 = arith.constant 4 : index
    %c0_103 = arith.constant 0 : index
    %c0_104 = arith.constant 0 : index
    %c0_105 = arith.constant 0 : index
    %212 = vector.load %arg6[%c4_102, %c0_103, %c0_104, %c0_105] : memref<6x4x1x8xf32, #tpu.memory_space<vmem>>, vector<1x4x1x8xf32>
    %213 = vector.shape_cast %212 : vector<1x4x1x8xf32> to vector<4x1x8xf32>
    %214 = vector.broadcast %213 : vector<4x1x8xf32> to vector<4x8x8xf32>
    %215 = arith.addf %211, %214 : vector<4x8x8xf32>
    %c5_106 = arith.constant 5 : index
    %c0_107 = arith.constant 0 : index
    %c0_108 = arith.constant 0 : index
    %c0_109 = arith.constant 0 : index
    %216 = vector.load %arg7[%c5_106, %c0_107, %c0_108, %c0_109] : memref<6x4x32x8xbf16, #tpu.memory_space<vmem>>, vector<1x4x32x8xbf16>
    %217 = vector.shape_cast %216 : vector<1x4x32x8xbf16> to vector<4x32x8xbf16>
    "tpu.trace_start"() <{level = 10 : i32, message = "htd,hdf->htf"}> : () -> ()
    %cst_110 = arith.constant dense<0.000000e+00> : vector<4x8x8xf32>
    %218 = tpu.matmul %201, %217, %cst_110 {dimension_numbers = #tpu.dot_dimension_numbers<[2], [1], [1], [2], [0, 0, 0, 1, 1, 2], [0], [0]>} : vector<4x8x32xbf16>, vector<4x32x8xbf16>, vector<4x8x8xf32> -> vector<4x8x8xf32>
    "tpu.trace_stop"() : () -> ()
    %c5_111 = arith.constant 5 : index
    %c0_112 = arith.constant 0 : index
    %c0_113 = arith.constant 0 : index
    %c0_114 = arith.constant 0 : index
    %219 = vector.load %arg6[%c5_111, %c0_112, %c0_113, %c0_114] : memref<6x4x1x8xf32, #tpu.memory_space<vmem>>, vector<1x4x1x8xf32>
    %220 = vector.shape_cast %219 : vector<1x4x1x8xf32> to vector<4x1x8xf32>
    %221 = vector.broadcast %220 : vector<4x1x8xf32> to vector<4x8x8xf32>
    %222 = arith.addf %218, %221 : vector<4x8x8xf32>
    "tpu.trace_start"() <{level = 10 : i32, message = "hqd,hkd->hqk"}> : () -> ()
    %cst_115 = arith.constant dense<0.000000e+00> : vector<4x8x8xf32>
    %223 = tpu.matmul %208, %215, %cst_115 {dimension_numbers = #tpu.dot_dimension_numbers<[2], [2], [1], [1], [0, 0, 0, 1, 1, 1], [0], [0]>} : vector<4x8x8xf32>, vector<4x8x8xf32>, vector<4x8x8xf32> -> vector<4x8x8xf32>
    "tpu.trace_stop"() : () -> ()
    %224 = arith.addf %223, %32 : vector<4x8x8xf32>
    %cst_116 = arith.constant dense<0xFF800000> : vector<4x8xf32>
    %225 = vector.multi_reduction <maximumf>, %224, %cst_116 [2] : vector<4x8x8xf32> to vector<4x8xf32>
    %226 = vector.shape_cast %225 : vector<4x8xf32> to vector<4x8x1xf32>
    %227 = vector.broadcast %226 : vector<4x8x1xf32> to vector<4x8x8xf32>
    %228 = arith.subf %224, %227 : vector<4x8x8xf32>
    %229 = math.exp %228 : vector<4x8x8xf32>
    %cst_117 = arith.constant dense<0.000000e+00> : vector<4x8xf32>
    %230 = vector.multi_reduction <add>, %229, %cst_117 [2] : vector<4x8x8xf32> to vector<4x8xf32>
    %231 = vector.shape_cast %230 : vector<4x8xf32> to vector<4x8x1xf32>
    %232 = tpu.reciprocal %231 {approx = true} : vector<4x8x1xf32> -> vector<4x8x1xf32>
    %233 = vector.broadcast %232 : vector<4x8x1xf32> to vector<4x8x8xf32>
    %234 = arith.mulf %229, %233 : vector<4x8x8xf32>
    "tpu.trace_start"() <{level = 10 : i32, message = "hqk,hkd->hqd"}> : () -> ()
    %cst_118 = arith.constant dense<0.000000e+00> : vector<4x8x8xf32>
    %235 = tpu.matmul %234, %222, %cst_118 {dimension_numbers = #tpu.dot_dimension_numbers<[2], [1], [1], [2], [0, 0, 0, 1, 1, 2], [0], [0]>} : vector<4x8x8xf32>, vector<4x8x8xf32>, vector<4x8x8xf32> -> vector<4x8x8xf32>
    "tpu.trace_stop"() : () -> ()
    %236 = arith.truncf %235 : vector<4x8x8xf32> to vector<4x8x8xbf16>
    %c1_119 = arith.constant 1 : index
    %c0_120 = arith.constant 0 : index
    %c0_121 = arith.constant 0 : index
    %c0_122 = arith.constant 0 : index
    %237 = vector.load %arg8[%c1_119, %c0_120, %c0_121, %c0_122] : memref<2x4x8x32xbf16, #tpu.memory_space<vmem>>, vector<1x4x8x32xbf16>
    %238 = vector.shape_cast %237 : vector<1x4x8x32xbf16> to vector<4x8x32xbf16>
    "tpu.trace_start"() <{level = 10 : i32, message = "htf,hfd->htd"}> : () -> ()
    %cst_123 = arith.constant dense<0.000000e+00> : vector<4x8x32xf32>
    %239 = tpu.matmul %236, %238, %cst_123 {dimension_numbers = #tpu.dot_dimension_numbers<[2], [1], [1], [2], [0, 0, 0, 1, 1, 2], [0], [0]>} : vector<4x8x8xbf16>, vector<4x8x32xbf16>, vector<4x8x32xf32> -> vector<4x8x32xf32>
    "tpu.trace_stop"() : () -> ()
    %cst_124 = arith.constant dense<0.000000e+00> : vector<8x32xf32>
    %240 = vector.multi_reduction <add>, %239, %cst_124 [0] : vector<4x8x32xf32> to vector<8x32xf32>
    %241 = arith.addf %169, %240 : vector<8x32xf32>
    %c12 = arith.constant 12 : index
    %c0_125 = arith.constant 0 : index
    %242 = vector.load %arg4[%c12, %c0_125] : memref<16x32xf32, #tpu.memory_space<vmem>>, vector<1x32xf32>
    %243 = vector.shape_cast %242 : vector<1x32xf32> to vector<32xf32>
    %244 = vector.shape_cast %243 : vector<32xf32> to vector<1x32xf32>
    %245 = vector.broadcast %244 : vector<1x32xf32> to vector<8x32xf32>
    %246 = arith.addf %241, %245 : vector<8x32xf32>
    %c10 = arith.constant 10 : index
    %c0_126 = arith.constant 0 : index
    %247 = vector.load %arg4[%c10, %c0_126] : memref<16x32xf32, #tpu.memory_space<vmem>>, vector<1x32xf32>
    %248 = vector.shape_cast %247 : vector<1x32xf32> to vector<32xf32>
    %c11 = arith.constant 11 : index
    %c0_127 = arith.constant 0 : index
    %249 = vector.load %arg4[%c11, %c0_127] : memref<16x32xf32, #tpu.memory_space<vmem>>, vector<1x32xf32>
    %250 = vector.shape_cast %249 : vector<1x32xf32> to vector<32xf32>
    %cst_128 = arith.constant dense<0.000000e+00> : vector<8xf32>
    %251 = vector.multi_reduction <add>, %246, %cst_128 [1] : vector<8x32xf32> to vector<8xf32>
    %252 = vector.shape_cast %251 : vector<8xf32> to vector<8x1xf32>
    %cst_129 = arith.constant 3.200000e+01 : f32
    %253 = vector.broadcast %cst_129 : f32 to vector<8x1xf32>
    %254 = arith.divf %252, %253 : vector<8x1xf32>
    %255 = vector.broadcast %254 : vector<8x1xf32> to vector<8x32xf32>
    %256 = arith.subf %246, %255 : vector<8x32xf32>
    %257 = arith.mulf %256, %256 : vector<8x32xf32>
    %cst_130 = arith.constant dense<0.000000e+00> : vector<8xf32>
    %258 = vector.multi_reduction <add>, %257, %cst_130 [1] : vector<8x32xf32> to vector<8xf32>
    %259 = vector.shape_cast %258 : vector<8xf32> to vector<8x1xf32>
    %cst_131 = arith.constant 3.200000e+01 : f32
    %260 = vector.broadcast %cst_131 : f32 to vector<8x1xf32>
    %261 = arith.divf %259, %260 : vector<8x1xf32>
    %262 = vector.broadcast %254 : vector<8x1xf32> to vector<8x32xf32>
    %263 = arith.subf %246, %262 : vector<8x32xf32>
    %cst_132 = arith.constant 9.99999974E-6 : f32
    %264 = vector.broadcast %cst_132 : f32 to vector<8x1xf32>
    %265 = arith.addf %261, %264 : vector<8x1xf32>
    %266 = math.rsqrt %265 : vector<8x1xf32>
    %267 = vector.broadcast %266 : vector<8x1xf32> to vector<8x32xf32>
    %268 = arith.mulf %263, %267 : vector<8x32xf32>
    %269 = vector.shape_cast %248 : vector<32xf32> to vector<1x32xf32>
    %270 = vector.broadcast %269 : vector<1x32xf32> to vector<8x32xf32>
    %271 = arith.mulf %268, %270 : vector<8x32xf32>
    %272 = vector.shape_cast %250 : vector<32xf32> to vector<1x32xf32>
    %273 = vector.broadcast %272 : vector<1x32xf32> to vector<8x32xf32>
    %274 = arith.addf %271, %273 : vector<8x32xf32>
    %275 = arith.truncf %274 : vector<8x32xf32> to vector<8x32xbf16>
    %c1_133 = arith.constant 1 : index
    %c0_134 = arith.constant 0 : index
    %c0_135 = arith.constant 0 : index
    %276 = vector.load %arg9[%c1_133, %c0_134, %c0_135] : memref<2x32x128xbf16, #tpu.memory_space<vmem>>, vector<1x32x128xbf16>
    %277 = vector.shape_cast %276 : vector<1x32x128xbf16> to vector<32x128xbf16>
    %cst_136 = arith.constant dense<0.000000e+00> : vector<8x128xf32>
    %278 = tpu.matmul %275, %277, %cst_136 {dimension_numbers = #tpu.dot_dimension_numbers<[1], [0], [0], [1], [0, 0, 1, 1], [], []>} : vector<8x32xbf16>, vector<32x128xbf16>, vector<8x128xf32> -> vector<8x128xf32>
    %c1_137 = arith.constant 1 : index
    %c0_138 = arith.constant 0 : index
    %279 = vector.load %arg5[%c1_137, %c0_138] : memref<3x128xf32, #tpu.memory_space<vmem>>, vector<1x128xf32>
    %280 = vector.shape_cast %279 : vector<1x128xf32> to vector<128xf32>
    %281 = vector.shape_cast %280 : vector<128xf32> to vector<1x128xf32>
    %282 = vector.broadcast %281 : vector<1x128xf32> to vector<8x128xf32>
    %283 = arith.addf %278, %282 : vector<8x128xf32>
    %cst_139 = arith.constant 5.000000e-01 : f32
    %284 = vector.broadcast %cst_139 : f32 to vector<8x128xf32>
    %285 = arith.mulf %284, %283 : vector<8x128xf32>
    %286 = arith.mulf %283, %283 : vector<8x128xf32>
    %287 = arith.mulf %283, %286 : vector<8x128xf32>
    %cst_140 = arith.constant 4.471500e-02 : f32
    %288 = vector.broadcast %cst_140 : f32 to vector<8x128xf32>
    %289 = arith.mulf %288, %287 : vector<8x128xf32>
    %290 = arith.addf %283, %289 : vector<8x128xf32>
    %cst_141 = arith.constant 0.797884583 : f32
    %291 = vector.broadcast %cst_141 : f32 to vector<8x128xf32>
    %292 = arith.mulf %291, %290 : vector<8x128xf32>
    %293 = math.tanh %292 : vector<8x128xf32>
    %cst_142 = arith.constant 1.000000e+00 : f32
    %294 = vector.broadcast %cst_142 : f32 to vector<8x128xf32>
    %295 = arith.addf %294, %293 : vector<8x128xf32>
    %296 = arith.mulf %285, %295 : vector<8x128xf32>
    %297 = arith.truncf %296 : vector<8x128xf32> to vector<8x128xbf16>
    %c1_143 = arith.constant 1 : index
    %c0_144 = arith.constant 0 : index
    %c0_145 = arith.constant 0 : index
    %298 = vector.load %arg10[%c1_143, %c0_144, %c0_145] : memref<2x128x32xbf16, #tpu.memory_space<vmem>>, vector<1x128x32xbf16>
    %299 = vector.shape_cast %298 : vector<1x128x32xbf16> to vector<128x32xbf16>
    %cst_146 = arith.constant dense<0.000000e+00> : vector<8x32xf32>
    %300 = tpu.matmul %297, %299, %cst_146 {dimension_numbers = #tpu.dot_dimension_numbers<[1], [0], [0], [1], [0, 0, 1, 1], [], []>} : vector<8x128xbf16>, vector<128x32xbf16>, vector<8x32xf32> -> vector<8x32xf32>
    %c13 = arith.constant 13 : index
    %c0_147 = arith.constant 0 : index
    %301 = vector.load %arg4[%c13, %c0_147] : memref<16x32xf32, #tpu.memory_space<vmem>>, vector<1x32xf32>
    %302 = vector.shape_cast %301 : vector<1x32xf32> to vector<32xf32>
    %303 = vector.shape_cast %302 : vector<32xf32> to vector<1x32xf32>
    %304 = vector.broadcast %303 : vector<1x32xf32> to vector<8x32xf32>
    %305 = arith.addf %300, %304 : vector<8x32xf32>
    %306 = arith.addf %246, %305 : vector<8x32xf32>
    %c14 = arith.constant 14 : index
    %c0_148 = arith.constant 0 : index
    %307 = vector.load %arg4[%c14, %c0_148] : memref<16x32xf32, #tpu.memory_space<vmem>>, vector<1x32xf32>
    %308 = vector.shape_cast %307 : vector<1x32xf32> to vector<32xf32>
    %c15 = arith.constant 15 : index
    %c0_149 = arith.constant 0 : index
    %309 = vector.load %arg4[%c15, %c0_149] : memref<16x32xf32, #tpu.memory_space<vmem>>, vector<1x32xf32>
    %310 = vector.shape_cast %309 : vector<1x32xf32> to vector<32xf32>
    %cst_150 = arith.constant dense<0.000000e+00> : vector<8xf32>
    %311 = vector.multi_reduction <add>, %306, %cst_150 [1] : vector<8x32xf32> to vector<8xf32>
    %312 = vector.shape_cast %311 : vector<8xf32> to vector<8x1xf32>
    %cst_151 = arith.constant 3.200000e+01 : f32
    %313 = vector.broadcast %cst_151 : f32 to vector<8x1xf32>
    %314 = arith.divf %312, %313 : vector<8x1xf32>
    %315 = vector.broadcast %314 : vector<8x1xf32> to vector<8x32xf32>
    %316 = arith.subf %306, %315 : vector<8x32xf32>
    %317 = arith.mulf %316, %316 : vector<8x32xf32>
    %cst_152 = arith.constant dense<0.000000e+00> : vector<8xf32>
    %318 = vector.multi_reduction <add>, %317, %cst_152 [1] : vector<8x32xf32> to vector<8xf32>
    %319 = vector.shape_cast %318 : vector<8xf32> to vector<8x1xf32>
    %cst_153 = arith.constant 3.200000e+01 : f32
    %320 = vector.broadcast %cst_153 : f32 to vector<8x1xf32>
    %321 = arith.divf %319, %320 : vector<8x1xf32>
    %322 = vector.broadcast %314 : vector<8x1xf32> to vector<8x32xf32>
    %323 = arith.subf %306, %322 : vector<8x32xf32>
    %cst_154 = arith.constant 9.99999974E-6 : f32
    %324 = vector.broadcast %cst_154 : f32 to vector<8x1xf32>
    %325 = arith.addf %321, %324 : vector<8x1xf32>
    %326 = math.rsqrt %325 : vector<8x1xf32>
    %327 = vector.broadcast %326 : vector<8x1xf32> to vector<8x32xf32>
    %328 = arith.mulf %323, %327 : vector<8x32xf32>
    %329 = vector.shape_cast %308 : vector<32xf32> to vector<1x32xf32>
    %330 = vector.broadcast %329 : vector<1x32xf32> to vector<8x32xf32>
    %331 = arith.mulf %328, %330 : vector<8x32xf32>
    %332 = vector.shape_cast %310 : vector<32xf32> to vector<1x32xf32>
    %333 = vector.broadcast %332 : vector<1x32xf32> to vector<8x32xf32>
    %334 = arith.addf %331, %333 : vector<8x32xf32>
    %335 = arith.truncf %334 : vector<8x32xf32> to vector<8x32xbf16>
    %c0_155 = arith.constant 0 : index
    %c0_156 = arith.constant 0 : index
    %336 = vector.load %arg11[%c0_155, %c0_156] : memref<32x128xbf16, #tpu.memory_space<vmem>>, vector<32x128xbf16>
    %cst_157 = arith.constant dense<0.000000e+00> : vector<8x128xf32>
    %337 = tpu.matmul %335, %336, %cst_157 {dimension_numbers = #tpu.dot_dimension_numbers<[1], [0], [0], [1], [0, 0, 1, 1], [], []>} : vector<8x32xbf16>, vector<32x128xbf16>, vector<8x128xf32> -> vector<8x128xf32>
    %c2_158 = arith.constant 2 : index
    %c0_159 = arith.constant 0 : index
    %338 = vector.load %arg5[%c2_158, %c0_159] : memref<3x128xf32, #tpu.memory_space<vmem>>, vector<1x128xf32>
    %339 = vector.shape_cast %338 : vector<1x128xf32> to vector<128xf32>
    %340 = vector.shape_cast %339 : vector<128xf32> to vector<1x128xf32>
    %341 = vector.broadcast %340 : vector<1x128xf32> to vector<8x128xf32>
    %342 = arith.addf %337, %341 : vector<8x128xf32>
    %c0_160 = arith.constant 0 : index
    %c0_161 = arith.constant 0 : index
    %343 = vector.load %arg12[%c0_160, %c0_161] : memref<8x128xf32, #tpu.memory_space<vmem>>, vector<8x128xf32>
    tpu.vector_store %arg12[%c0_160, %c0_161], %342 {strides = array<i32>} : memref<8x128xf32, #tpu.memory_space<vmem>>, vector<8x128xf32>,
    return
  }
  func.func @transform_0(%arg0: i32) -> (i32, i32) {
    %c0_i32 = arith.constant 0 : i32
    %c0_i32_0 = arith.constant 0 : i32
    return %arg0, %c0_i32 : i32, i32
  }
  func.func @transform_1(%arg0: i32) -> (i32, i32) {
    %c0_i32 = arith.constant 0 : i32
    %c0_i32_0 = arith.constant 0 : i32
    %c0_i32_1 = arith.constant 0 : i32
    return %c0_i32, %c0_i32_0 : i32, i32
  }
  func.func @transform_2(%arg0: i32) -> (i32, i32, i32) {
    %c0_i32 = arith.constant 0 : i32
    %c0_i32_0 = arith.constant 0 : i32
    %c0_i32_1 = arith.constant 0 : i32
    %c0_i32_2 = arith.constant 0 : i32
    return %c0_i32, %c0_i32_0, %c0_i32_1 : i32, i32, i32
  }
  func.func @transform_3(%arg0: i32) -> (i32, i32) {
    %c0_i32 = arith.constant 0 : i32
    %c0_i32_0 = arith.constant 0 : i32
    %c0_i32_1 = arith.constant 0 : i32
    return %c0_i32, %c0_i32_0 : i32, i32
  }
  func.func @transform_4(%arg0: i32) -> (i32, i32) {
    %c0_i32 = arith.constant 0 : i32
    %c0_i32_0 = arith.constant 0 : i32
    %c0_i32_1 = arith.constant 0 : i32
    return %c0_i32, %c0_i32_0 : i32, i32
  }
  func.func @transform_5(%arg0: i32) -> (i32, i32, i32, i32) {
    %c0_i32 = arith.constant 0 : i32
    %c0_i32_0 = arith.constant 0 : i32
    %c0_i32_1 = arith.constant 0 : i32
    %c0_i32_2 = arith.constant 0 : i32
    %c0_i32_3 = arith.constant 0 : i32
    return %c0_i32, %c0_i32_0, %c0_i32_1, %c0_i32_2 : i32, i32, i32, i32
  }
  func.func @transform_6(%arg0: i32) -> (i32, i32, i32, i32) {
    %c0_i32 = arith.constant 0 : i32
    %c0_i32_0 = arith.constant 0 : i32
    %c0_i32_1 = arith.constant 0 : i32
    %c0_i32_2 = arith.constant 0 : i32
    %c0_i32_3 = arith.constant 0 : i32
    return %c0_i32, %c0_i32_0, %c0_i32_1, %c0_i32_2 : i32, i32, i32, i32
  }
  func.func @transform_7(%arg0: i32) -> (i32, i32, i32, i32) {
    %c0_i32 = arith.constant 0 : i32
    %c0_i32_0 = arith.constant 0 : i32
    %c0_i32_1 = arith.constant 0 : i32
    %c0_i32_2 = arith.constant 0 : i32
    %c0_i32_3 = arith.constant 0 : i32
    return %c0_i32, %c0_i32_0, %c0_i32_1, %c0_i32_2 : i32, i32, i32, i32
  }
  func.func @transform_8(%arg0: i32) -> (i32, i32, i32) {
    %c0_i32 = arith.constant 0 : i32
    %c0_i32_0 = arith.constant 0 : i32
    %c0_i32_1 = arith.constant 0 : i32
    %c0_i32_2 = arith.constant 0 : i32
    return %c0_i32, %c0_i32_0, %c0_i32_1 : i32, i32, i32
  }
  func.func @transform_9(%arg0: i32) -> (i32, i32, i32) {
    %c0_i32 = arith.constant 0 : i32
    %c0_i32_0 = arith.constant 0 : i32
    %c0_i32_1 = arith.constant 0 : i32
    %c0_i32_2 = arith.constant 0 : i32
    return %c0_i32, %c0_i32_0, %c0_i32_1 : i32, i32, i32
  }
  func.func @transform_10(%arg0: i32) -> (i32, i32) {
    %c0_i32 = arith.constant 0 : i32
    %c0_i32_0 = arith.constant 0 : i32
    %c0_i32_1 = arith.constant 0 : i32
    return %c0_i32, %c0_i32_0 : i32, i32
  }
  func.func @transform_11(%arg0: i32) -> (i32, i32) {
    %c0_i32 = arith.constant 0 : i32
    %c0_i32_0 = arith.constant 0 : i32
    return %arg0, %c0_i32 : i32, i32
  }
}

</mosaic_0001>

<bundles_post_ra>
// kernel: eq.8
= control target key start
LH: loop header
LB: loop body
LE: loop exit
PB: predicated region body
PF: predicated region fallthrough
CT: control target
= control target key end

     0   :  { %vm7_vm0 = vcmask 64512   ;;  %vm13_vm1 = vcmask 130112   ;;  %s39_s0 = inlined_call_operand.vmem [shape: s32[2,8], index: 0, kind: input, shape index: {}]   ;;  %s40_s1 = inlined_call_operand.vmem [shape: s32[16], index: 1, kind: output, shape index: {}]  }
   0x1   :  { %v4_v0 = vld [vmem:[%s39_s0] sm:$0x3]  ;;  %s22_s0 = smov 8  }
   0x2   :  { %5 = vst [vmem:[#allocation1] sm:$0x3] %v4_v0 }
   0x9   :  { %v10_v1 = vld [vmem:[#allocation1 + $0x1] sm:$0x1]   ;;  %v6_v2 = vld [vmem:[#allocation1] sm:$0x1]  }
   0xa   :  { %11 = vrot.lane.b32.xlu0 %v10_v1, %s22_s0  ;;  %8 = vst.msk [vmem:[#allocation0] sm:$0x1] %vm7_vm0, %v6_v2  }
  0x7c   :  { %v12_v3 = vpop.permute.xlu0 %11  }
  0x7d   :  { %14 = vst.msk [vmem:[#allocation0] sm:$0x1] %vm13_vm1, %v12_v3  }
  0x84   :  { %v17_v4 = vld [vmem:[#allocation0] sm:$0x1] }
  0x85   :  { %20 = vst [vmem:[%s40_s1] sm:$0x1] %v17_v4 }

// kernel: gpt_forward.1
= control target key start
LH: loop header
LB: loop body
LE: loop exit
PB: predicated region body
PF: predicated region fallthrough
CT: control target
= control target key end

     0   :  { %s3219_s17 = smov 0   ;;  %s3795_s0 = inlined_call_operand.vmem [shape: f32[16,128], index: 0, kind: input, shape index: {}]   ;;  %s3796_s1 = inlined_call_operand.vmem [shape: bf16[128,32], index: 1, kind: input, shape index: {}]   ;;  %s3797_s2 = inlined_call_operand.vmem [shape: f32[4,8,8], index: 2, kind: input, shape index: {}]   ;;  %s3798_s3 = inlined_call_operand.vmem [shape: f32[16,32], index: 3, kind: input, shape index: {}]   ;;  %s3799_s4 = inlined_call_operand.vmem [shape: f32[3,128], index: 4, kind: input, shape index: {}]   ;;  %s3800_s5 = inlined_call_operand.vmem [shape: f32[6,4,1,8], index: 5, kind: input, shape index: {}]   ;;  %s3801_s6 = inlined_call_operand.vmem [shape: bf16[6,4,32,8], index: 6, kind: input, shape index: {}]   ;;  %s3802_s7 = inlined_call_operand.vmem [shape: bf16[2,4,8,32], index: 7, kind: input, shape index: {}]   ;;  %s3803_s8 = inlined_call_operand.vmem [shape: bf16[2,32,128], index: 8, kind: input, shape index: {}]   ;;  %s3804_s9 = inlined_call_operand.vmem [shape: bf16[2,128,32], index: 9, kind: input, shape index: {}]   ;;  %s3805_s10 = inlined_call_operand.vmem [shape: bf16[32,128], index: 10, kind: input, shape index: {}]   ;;  %s3806_s11 = inlined_call_operand.vmem [shape: f32[16,128], index: 11, kind: output, shape index: {}]  }
   0x1 LB: > { %s2466_s18 = sadd.s32 4294967295, %s3156_s17   ;;  %p2470_p0 = scmp.ge.s32.totalorder %s3156_s17, 1  ;;  %s3156_s17 = sphi %s3219_s17, %s21_s17  }
   0x2   : > { %p336_p1 = scmp.lt.s32.totalorder %s3156_s17, 3 }
   0x4   : > { %p337_p2 = pnand %p2470_p0, %p336_p1 }
   0x5   : > { %p374_p3 = scmp.lt.s32.totalorder (!%p337_p2), %s2466_s18, 1 }
   0x6   : > { %340 = sbr.rel (%p337_p2) target bundleno = 4152 (0x1038), region = 64 }
   0xb   : > { %v2977_v0 = vld [vmem:[%s3796_s1 + $0x38] sm:$0xff]  ;;  %v2976_v1 = vld [vmem:[%s3796_s1 + $0x30] sm:$0xff]  ;;  %v2975_v2 = vld [vmem:[%s3796_s1 + $0x28] sm:$0xff]  ;;  %s3808_s18 = smov (!%p374_p3, %s2466_s18), 1  ;;  %vm464_vm0 = vcmask 261120   ;;  %v3158_v13 = vmov 32.0  }
   0xc   : > { %449 = vmatpush.bf16.msra.mxu0 %v2977_v0  ;;  %v2974_v3 = vld [vmem:[%s3796_s1 + $0x20] sm:$0xff]  ;;  %v2973_v4 = vld [vmem:[%s3796_s1 + $0x18] sm:$0xff]  ;;  %v2972_v5 = vld [vmem:[%s3796_s1 + $0x10] sm:$0xff]  ;;  %s2471_s12 = sshll.u32 %s3808_s18, 3  ;;  %3100 = vrcp.f32 %v3158_v13  ;;  %vm934_vm8 = vcmask 64512   ;;  %vm1186_vm9 = vcmask 1043456  }
   0xd   : > { %v2971_v6 = vld [vmem:[%s3796_s1 + $0x8] sm:$0xff]  ;;  %s377_s19 = scalar_lea.vmem %s3795_s0, %s2471_s12  ;;  %v2970_v7 = vld [vmem:[%s3796_s1] sm:$0xff]  ;;  %v2981_v47 = vld [vmem:[%s3801_s6 + $0x18] sm:$0xff]  ;;  %s381_s16 = scalar_lea.vmem %s3806_s11, %s2471_s12 }
   0xe   : > { %v383_v8 = vld [vmem:[%s377_s19] sm:$0xff]  ;;  %v2979_v46 = vld [vmem:[%s3801_s6 + $0x8] sm:$0xff]  ;;  %609 = vmatpush.bf16.msra.mxu2 %v2981_v47  ;;  %v2980_v50 = vld [vmem:[%s3801_s6 + $0x10] sm:$0xff] }
   0xf   : > { %v384_v9 = vpack.c.bf16 %v383_v8, %v383_v8  ;;  %v3057_v34 = vld [vmem:[%s3798_s3] ss:$0 sm:$0xff]  ;;  %v3058_v37 = vld [vmem:[%s3798_s3 + $0x1] ss:$0 sm:$0xff]  ;;  %v2983_v48 = vld [vmem:[%s3801_s6 + $0x28] sm:$0xff]  ;;  %584 = vmatpush.bf16.msra.mxu1 %v2979_v46 }
  0x10   : > { %450 = vmatpush.bf16.msra.mxu0 %v2976_v1  ;;  %634 = vmatpush.bf16.msra.mxu3 %v2983_v48  ;;  %v2978_v49 = vld [vmem:[%s3801_s6] sm:$0xff]  ;;  %v2985_v53 = vld [vmem:[%s3801_s6 + $0x38] sm:$0xff]  ;;  %v2987_v54 = vld [vmem:[%s3801_s6 + $0x48] sm:$0xff] }
  0x11   : > { %v2982_v51 = vld [vmem:[%s3801_s6 + $0x20] sm:$0xff]  ;;  %v2989_v55 = vld [vmem:[%s3801_s6 + $0x58] sm:$0xff]  ;;  %v2984_v57 = vld [vmem:[%s3801_s6 + $0x30] sm:$0xff] }
  0x12   : > { %v3101_v14 = vpop.eup %3100  ;;  %610 = vmatpush.bf16.msra.mxu2 %v2980_v50  ;;  %v2986_v58 = vld [vmem:[%s3801_s6 + $0x40] sm:$0xff]  ;;  %v2988_v60 = vld [vmem:[%s3801_s6 + $0x50] sm:$0xff]  ;;  %v3069_v50 = vld [vmem:[%s3800_s5 + $0x8] ss:$0 sm:$0xff] }
  0x13   : > { %v469_v15 = vmul.f32 32.0, %v3101_v14  ;;  %vm473_vm1 = vweird.f32 %v3101_v14  ;;  %585 = vmatpush.bf16.msra.mxu1 %v2978_v49  ;;  %v2990_v13 = vld [vmem:[%s3801_s6 + $0x60] sm:$0xff] }
  0x14   : > { %451 = vmatpush.bf16.msra.mxu0 %v2975_v2  ;;  %635 = vmatpush.bf16.msra.mxu3 %v2982_v51  ;;  %v3068_v48 = vld [vmem:[%s3800_s5 + $0x7] ss:$0 sm:$0xff]  ;;  %v3064_v51 = vld [vmem:[%s3800_s5 + $0x3] ss:$0 sm:$0xff] }
  0x15   : > { %v470_v16 = vsub.f32 1.0, %v469_v15  ;;  %v2994_v15 = vld [vmem:[%s3801_s6 + $0x80] sm:$0xff] }
  0x16   : > { %718 = vmatpush.bf16.msrb.mxu2 %v2987_v54 }
  0x17   : > { %v471_v17 = vmul.f32 %v3101_v14, %v470_v16  ;;  %659 = vmatpush.bf16.msrb.mxu1 %v2985_v53  ;;  %v2997_v16 = vld [vmem:[%s3801_s6 + $0x98] sm:$0xff] }
  0x18   : > { %452 = vmatpush.bf16.msra.mxu0 %v2974_v3  ;;  %743 = vmatpush.bf16.msrb.mxu3 %v2989_v55  ;;  %v3059_v3 = vld [vmem:[%s3798_s3 + $0x2] ss:$0 sm:$0xff] }
  0x19   : > { %v472_v18 = vadd.f32 %v3101_v14, %v471_v17  ;;  %v2999_v17 = vld [vmem:[%s3801_s6 + $0xa8] sm:$0xff] }
  0x1a   : > { %719 = vmatpush.bf16.msrb.mxu2 %v2986_v58  ;;  %v3070_v58 = vld [vmem:[%s3800_s5 + $0xa] ss:$0 sm:$0xff] }
  0x1b   : > { %v3260_v19 = vsel %vm473_vm1, %v3101_v14, %v472_v18  ;;  %660 = vmatpush.bf16.msrb.mxu1 %v2984_v57  ;;  %v2992_v14 = vld [vmem:[%s3801_s6 + $0x70] sm:$0xff] }
  0x1c   : > { %453 = vmatpush.bf16.msra.mxu0 %v2973_v4  ;;  %744 = vmatpush.bf16.msrb.mxu3 %v2988_v60  ;;  %v2996_v18 = vld [vmem:[%s3801_s6 + $0x90] sm:$0xff] }
  0x20   : > { %454 = vmatpush.bf16.msra.mxu0 %v2972_v5  ;;  %v3060_v5 = vld [vmem:[%s3798_s3 + $0x3] ss:$0 sm:$0xff] }
  0x24   : > { %455 = vmatpush.bf16.msra.mxu0 %v2971_v6 }
  0x28   : > { %456 = vmatpush.bf16.msra.mxu0 %v2970_v7 }
  0x2b   : > { %457 = vmatmul.bf16.vlgmr.msra.gmra.mxu0 %v384_v9  ;;  %v2991_v9 = vld [vmem:[%s3801_s6 + $0x68] sm:$0xff] }
  0xa8   : > { %v458_v10 = vpop.f32.mrf.mxu0 }
  0xa9   : > { %v465_v11 = vsel %vm464_vm0, %v458_v10, 0.0 }
  0xaa   : > { %466 = vadd.xlane.f32.xlu0 %v465_v11  ;;  %v2993_v11 = vld [vmem:[%s3801_s6 + $0x78] sm:$0xff] }
  0xb0   : > { %v460_v12 = vpop.f32.mrf.mxu0 }
  0xb1   : > { %v2995_v12 = vld [vmem:[%s3801_s6 + $0x88] sm:$0xff] }
 0x11d   : > { %v467_v20 = vpop.xlane.xlu0 %466 }
 0x11e   : > { %v475_v21 = vmul.f32 %v3260_v19, %v467_v20  ;;  %v2998_v20 = vld [vmem:[%s3801_s6 + $0xa0] sm:$0xff] }
 0x120   : > { %v476_v22 = vsub.f32 %v458_v10, %v475_v21  ;;  %v3001_v21 = vld [vmem:[%s3801_s6 + $0xb8] sm:$0xff] }
 0x122   : > { %v477_v23 = vmul.f32 %v476_v22, %v476_v22 }
 0x124   : > { %v478_v24 = vsel %vm464_vm0, %v477_v23, 0.0 }
 0x125   : > { %479 = vadd.xlane.f32.xlu0 %v478_v24 }
 0x198   : > { %v480_v25 = vpop.xlane.xlu0 %479 }
 0x199   : > { %v481_v26 = vmul.f32 %v480_v25, %v3260_v19 }
 0x19b   : > { %v482_v27 = vadd.f32 1e-05, %v481_v26 }
 0x19d   : > { %3102 = vrsqrt.f32 %v482_v27  ;;  %vm489_vm3 = vweird.f32 %v482_v27 }
 0x1a3   : > { %v3103_v28 = vpop.eup %3102 }
 0x1a4   : > { %v484_v29 = vmul.f32 %v3103_v28, %v482_v27  ;;  %vm490_vm2 = vweird.f32 %v3103_v28 }
 0x1a5   : > { %vm491_vm4 = vmor %vm489_vm3, %vm490_vm2 }
 0x1a6   : > { %v485_v30 = vmul.f32 %v3103_v28, %v484_v29 }
 0x1a8   : > { %v486_v31 = vmul.f32 0.5, %v485_v30  ;;  %v3065_v30 = vld [vmem:[%s3800_s5 + $0x4] ss:$0 sm:$0xff] }
 0x1aa   : > { %v487_v32 = vsub.f32 1.5, %v486_v31  ;;  %v3066_v31 = vld [vmem:[%s3800_s5 + $0x5] ss:$0 sm:$0xff] }
 0x1ac   : > { %v488_v33 = vmul.f32 %v3103_v28, %v487_v32  ;;  %v3061_v32 = vld [vmem:[%s3800_s5] ss:$0 sm:$0xff] }
 0x1ae   : > { %v492_v35 = vsel %vm491_vm4, %v3103_v28, %v488_v33 }
 0x1af   : > { %v493_v36 = vmul.f32 %v492_v35, %v476_v22  ;;  %v3000_v22 = vld [vmem:[%s3801_s6 + $0xb0] sm:$0xff] }
 0x1b1   : > { %v495_v38 = vmul.f32 %v3057_v34, %v493_v36  ;;  %v3062_v34 = vld [vmem:[%s3800_s5 + $0x1] ss:$0 sm:$0xff] }
 0x1b3   : > { %v3271_v39 = vadd.f32 %v3058_v37, %v495_v38 }
 0x1b5   : > { %v504_v40 = vsel %vm464_vm0, %v3271_v39, 0.0 }
 0x1b6   : > { %505 = vadd.xlane.f32.xlu1 %v504_v40 }
 0x229   : > { %v506_v41 = vpop.xlane.xlu1 %505 }
 0x22a   : > { %v507_v42 = vmul.f32 %v506_v41, %v3260_v19 }
 0x22c   : > { %v508_v43 = vsub.f32 %v3271_v39, %v507_v42  ;;  %v3067_v42 = vld [vmem:[%s3800_s5 + $0x6] ss:$0 sm:$0xff] }
 0x22e   : > { %v509_v44 = vmul.f32 %v508_v43, %v508_v43 }
 0x230   : > { %v510_v45 = vsel %vm464_vm0, %v509_v44, 0.0 }
 0x231   : > { %511 = vadd.xlane.f32.xlu1 %v510_v45  ;;  %v3063_v45 = vld [vmem:[%s3800_s5 + $0x2] ss:$0 sm:$0xff] }
 0x2a4   : > { %v512_v52 = vpop.xlane.xlu1 %511 }
 0x2a5   : > { %v513_v56 = vmul.f32 %v512_v52, %v3260_v19 }
 0x2a7   : > { %v514_v59 = vadd.f32 1e-05, %v513_v56 }
 0x2a9   : > { %3104 = vrsqrt.f32 %v514_v59  ;;  %vm521_vm6 = vweird.f32 %v514_v59 }
 0x2af   : > { %v3105_v61 = vpop.eup %3104 }
 0x2b0   : > { %v516_v62 = vmul.f32 %v3105_v61, %v514_v59  ;;  %vm522_vm5 = vweird.f32 %v3105_v61 }
 0x2b1   : > { %vm523_vm7 = vmor %vm521_vm6, %vm522_vm5 }
 0x2b2   : > { %v517_v63 = vmul.f32 %v3105_v61, %v516_v62 }
 0x2b4   : > { %v518_v0 = vmul.f32 0.5, %v517_v63  ;;  %v3071_v63 = vld [vmem:[%s3800_s5 + $0x9] ss:$0 sm:$0xff] }
 0x2b6   : > { %v519_v1 = vsub.f32 1.5, %v518_v0 }
 0x2b8   : > { %v520_v2 = vmul.f32 %v3105_v61, %v519_v1 }
 0x2ba   : > { %v524_v4 = vsel %vm523_vm7, %v3105_v61, %v520_v2 }
 0x2bb   : > { %v525_v6 = vmul.f32 %v524_v4, %v508_v43  ;;  %v3072_v4 = vld [vmem:[%s3800_s5 + $0xb] ss:$0 sm:$0xff] }
 0x2bd   : > { %v527_v7 = vmul.f32 %v3059_v3, %v525_v6 }
 0x2bf   : > { %v529_v8 = vadd.f32 %v3060_v5, %v527_v7 }
 0x2c1   : > { %v530_v10 = vpack.c.bf16 %v529_v8, %v529_v8  ;;  %v3416_v8 = vld [vmem:[%s3797_s2 + $0x8] sm:$0xff] }
 0x2c3   : > { %2513 = vmatmul.msk.bf16.vlgmr.msra.gmra.mxu1 %vm464_vm0, %v530_v10  ;;  %2522 = vmatmul.msk.bf16.vlgmr.msra.gmra.mxu2 %vm464_vm0, %v530_v10 }
 0x2c4   : > { %2531 = vmatmul.msk.bf16.vlgmr.msra.gmra.mxu3 %vm464_vm0, %v530_v10  ;;  %768 = vmatpush.bf16.msra.mxu1 %v2991_v9 }
 0x2c5   : > { %793 = vmatpush.bf16.msra.mxu2 %v2993_v11  ;;  %852 = vmatpush.bf16.msra.mxu3 %v2995_v12  ;;  %v3423_v12 = vld [vmem:[%s3797_s2] sm:$0xff] }
 0x2c8   : > { %769 = vmatpush.bf16.msra.mxu1 %v2990_v13 }
 0x2c9   : > { %794 = vmatpush.bf16.msra.mxu2 %v2992_v14  ;;  %853 = vmatpush.bf16.msra.mxu3 %v2994_v15 }
 0x2d3   : > { %2540 = vmatmul.msk.bf16.vlgmr.msrb.gmra.mxu1 %vm464_vm0, %v530_v10  ;;  %2569 = vmatmul.msk.bf16.vlgmr.msrb.gmra.mxu2 %vm464_vm0, %v530_v10 }
 0x2d4   : > { %2578 = vmatmul.msk.bf16.vlgmr.msrb.gmra.mxu3 %vm464_vm0, %v530_v10  ;;  %877 = vmatpush.bf16.msrb.mxu2 %v2997_v16  ;;  %v3430_v16 = vld [vmem:[%s3797_s2 + $0x10] sm:$0xff] }
 0x2d5   : > { %902 = vmatpush.bf16.msrb.mxu1 %v2999_v17  ;;  %v3435_v17 = vld [vmem:[%s3797_s2 + $0x18] sm:$0xff] }
 0x2d8   : > { %878 = vmatpush.bf16.msrb.mxu2 %v2996_v18 }
 0x2d9   : > { %903 = vmatpush.bf16.msrb.mxu1 %v2998_v20 }
 0x2e3   : > { %2587 = vmatmul.msk.bf16.vlgmr.msra.gmra.mxu1 %vm464_vm0, %v530_v10  ;;  %2596 = vmatmul.msk.bf16.vlgmr.msra.gmra.mxu2 %vm464_vm0, %v530_v10 }
 0x2e4   : > { %2625 = vmatmul.msk.bf16.vlgmr.msra.gmra.mxu3 %vm464_vm0, %v530_v10  ;;  %927 = vmatpush.bf16.msra.mxu2 %v3001_v21 }
 0x2e8   : > { %928 = vmatpush.bf16.msra.mxu2 %v3000_v22 }
 0x2f3   : > { %2634 = vmatmul.msk.bf16.vlgmr.msrb.gmra.mxu2 %vm464_vm0, %v530_v10  ;;  %2643 = vmatmul.msk.bf16.vlgmr.msrb.gmra.mxu1 %vm464_vm0, %v530_v10 }
 0x303   : > { %2652 = vmatmul.msk.bf16.vlgmr.msra.gmra.mxu2 %vm464_vm0, %v530_v10 }
 0x340   : > { %v587_v23 = vpop.f32.mrf.mxu1 }
 0x341   : > { %v588_v40 = vadd.f32 %v3061_v32, %v587_v23 }
 0x346   : > { %v612_v24 = vpop.f32.mrf.mxu2 }
 0x347   : > { %v637_v25 = vpop.f32.mrf.mxu3  ;;  %v613_v41 = vadd.f32 %v3062_v34, %v612_v24 }
 0x348   : > { %v589_v26 = vpop.f32.mrf.mxu1  ;;  %v638_v49 = vadd.f32 %v3063_v45, %v637_v25 }
 0x34e   : > { %v614_v27 = vpop.f32.mrf.mxu2 }
 0x34f   : > { %v639_v28 = vpop.f32.mrf.mxu3 }
 0x350   : > { %v662_v29 = vpop.f32.mrf.mxu1 }
 0x351   : > { %v663_v57 = vadd.f32 %v3064_v51, %v662_v29 }
 0x356   : > { %v721_v33 = vpop.f32.mrf.mxu2 }
 0x357   : > { %v722_v35 = vadd.f32 %v3065_v30, %v721_v33  ;;  %v746_v36 = vpop.f32.mrf.mxu3 }
 0x358   : > { %v747_v37 = vadd.f32 %v3066_v31, %v746_v36  ;;  %v664_v38 = vpop.f32.mrf.mxu1 }
 0x359   : > { %2653 = vmatpush.xpose.msk.msrb.mxu3 %vm934_vm8, %v722_v35 }
 0x35a   : > { %2655 = vmatpush.xpose.msk.msrb.mxu0 %vm934_vm8, %v747_v37 }
 0x35c   : > { %2654 = vmatmul.msk.f32.vlgmr.msrb.gmra.mxu3 %vm934_vm8, %v588_v40 }
 0x35d   : > { %2656 = vmatmul.msk.f32.vlgmr.msrb.gmra.mxu0 %vm934_vm8, %v613_v41 }
 0x35e   : > { %v723_v43 = vpop.f32.mrf.mxu2 }
 0x35f   : > { %v748_v44 = vpop.f32.mrf.mxu3 }
 0x360   : > { %v771_v46 = vpop.f32.mrf.mxu1 }
 0x361   : > { %v772_v47 = vadd.f32 %v3067_v42, %v771_v46 }
 0x363   : > { %2657 = vmatpush.xpose.msk.msra.mxu3 %vm934_vm8, %v772_v47 }
 0x366   : > { %v796_v52 = vpop.f32.mrf.mxu2  ;;  %2658 = vmatmul.msk.f32.vlgmr.msra.gmra.mxu3 %vm934_vm8, %v638_v49 }
 0x367   : > { %v797_v53 = vadd.f32 %v3068_v48, %v796_v52  ;;  %v855_v54 = vpop.f32.mrf.mxu3 }
 0x368   : > { %v856_v55 = vadd.f32 %v3069_v50, %v855_v54  ;;  %v773_v56 = vpop.f32.mrf.mxu1 }
 0x369   : > { %2659 = vmatpush.xpose.msk.msra.mxu0 %vm934_vm8, %v797_v53 }
 0x36a   : > { %1101 = vmatpush.msra.mxu1 %v856_v55 }
 0x36c   : > { %2660 = vmatmul.msk.f32.vlgmr.msra.gmra.mxu0 %vm934_vm8, %v663_v57 }
 0x36e   : > { %v798_v59 = vpop.f32.mrf.mxu2 }
 0x36f   : > { %v857_v60 = vpop.f32.mrf.mxu3  ;;  %v1180_v59 = vld [vmem:[%s3802_s7 + $0x4] sm:$0xf] }
 0x370   : > { %v905_v61 = vpop.f32.mrf.mxu1 }
 0x371   : > { %v906_v62 = vadd.f32 %v3070_v58, %v905_v61  ;;  %v1179_v58 = vld [vmem:[%s3802_s7] sm:$0xf]  ;;  %v1207_v61 = vsel %vm1186_vm9, %v1180_v59, 0  ;;  %v3009_v59 = vld [vmem:[%s3804_s9 + $0x28] sm:$0xff] }
 0x372   : > { %v1188_v60 = vsel %vm1186_vm9, %v1179_v58, 0 }
 0x373   : > { %1147 = vmatpush.msrb.mxu3 %v906_v62  ;;  %1197 = vmatpush.bf16.msrb.mxu1 %v1188_v60  ;;  %v1182_v62 = vld [vmem:[%s3802_s7 + $0xc] sm:$0xf]  ;;  %v3008_v60 = vld [vmem:[%s3804_s9 + $0x20] sm:$0xff] }
 0x376   : > { %v880_v0 = vpop.f32.mrf.mxu2 }
 0x377   : > { %v881_v1 = vadd.f32 %v3071_v63, %v880_v0  ;;  %v1245_v63 = vsel %vm1186_vm9, %v1182_v62, 0  ;;  %v1181_v0 = vld [vmem:[%s3802_s7 + $0x8] sm:$0xf]  ;;  %v3006_v62 = vld [vmem:[%s3804_s9 + $0x10] sm:$0xff] }
 0x378   : > { %v907_v2 = vpop.f32.mrf.mxu1 }
 0x379   : > { %1124 = vmatpush.msrb.mxu2 %v881_v1  ;;  %v1226_v1 = vsel %vm1186_vm9, %v1181_v0, 0  ;;  %v3004_v0 = vld [vmem:[%s3804_s9] sm:$0xff] }
 0x37a   : > { %1235 = vmatpush.bf16.msra.mxu3 %v1226_v1  ;;  %v3076_v1 = vld [vmem:[%s3799_s4] ss:$0 sm:$0xff] }
 0x37b   : > { %1216 = vmatpush.bf16.msra.mxu2 %v1207_v61  ;;  %v3007_v61 = vld [vmem:[%s3804_s9 + $0x18] sm:$0xff] }
 0x37e   : > { %v882_v3 = vpop.f32.mrf.mxu2 }
 0x386   : > { %v930_v5 = vpop.f32.mrf.mxu2 }
 0x387   : > { %v931_v6 = vadd.f32 %v3072_v4, %v930_v5 }
 0x389   : > { %1170 = vmatpush.msrb.mxu0 %v931_v6 }
 0x38b   : > { %1254 = vmatpush.bf16.msra.mxu0 %v1245_v63  ;;  %v3005_v63 = vld [vmem:[%s3804_s9 + $0x8] sm:$0xff] }
 0x38e   : > { %v932_v7 = vpop.f32.mrf.mxu2 }
 0x3da   : > { %v984_v9 = vpop.f32.mrf.mxu0 }
 0x3db   : > { %v985_v10 = vadd.f32 %v984_v9, %v3416_v8 }
 0x3dd   : > { %v1042_v11 = vsel %vm934_vm8, %v985_v10, -inf }
 0x3de   : > { %1043 = vmax.xlane.f32.xlu2 %v1042_v11 }
 0x3df   : > { %v958_v13 = vpop.f32.mrf.mxu3 }
 0x3e0   : > { %v959_v14 = vadd.f32 %v958_v13, %v3423_v12 }
 0x3e2   : > { %v1039_v15 = vsel %vm934_vm8, %v959_v14, -inf }
 0x3e3   : > { %1040 = vmax.xlane.f32.xlu0 %v1039_v15 }
 0x3e9   : > { %v1010_v18 = vpop.f32.mrf.mxu3  ;;  %v1036_v20 = vpop.f32.mrf.mxu0 }
 0x3ea   : > { %v1011_v21 = vadd.f32 %v1010_v18, %v3430_v16  ;;  %v1037_v22 = vadd.f32 %v1036_v20, %v3435_v17 }
 0x3ec   : > { %v1048_v23 = vsel %vm934_vm8, %v1037_v22, -inf  ;;  %v1045_v24 = vsel %vm934_vm8, %v1011_v21, -inf }
 0x3ed   : > { %1049 = vmax.xlane.f32.xlu1 %v1048_v23  ;;  %1046 = vmax.xlane.f32.xlu2 %v1045_v24 }
 0x451   : > { %v1044_v25 = vpop.xlane.xlu2 %1043 }
 0x452   : > { %v1052_v26 = vsub.f32 %v985_v10, %v1044_v25 }
 0x454   : > { %v1057_v27 = vmul.f32 1.442695, %v1052_v26 }
 0x456   : > { %3106 = vpow2.f32 %v1057_v27  ;;  %v1041_v28 = vpop.xlane.xlu0 %1040 }
 0x457   : > { %v1051_v29 = vsub.f32 %v959_v14, %v1041_v28 }
 0x459   : > { %v1055_v30 = vmul.f32 1.442695, %v1051_v29  ;;  %v3073_v29 = vld [vmem:[%s3798_s3 + $0x6] ss:$0 sm:$0xff] }
 0x45b   : > { %3108 = vpow2.f32 %v1055_v30 }
 0x45c   : > { %v3107_v31 = vpop.eup %3106 }
 0x45d   : > { %v1066_v32 = vsel %vm934_vm8, %v3107_v31, 0.0 }
 0x45e   : > { %1067 = vadd.xlane.f32.xlu2 %v1066_v32 }
 0x460   : > { %v1050_v33 = vpop.xlane.xlu1 %1049  ;;  %v1047_v34 = vpop.xlane.xlu2 %1046 }
 0x461   : > { %v3109_v35 = vpop.eup %3108  ;;  %v1054_v36 = vsub.f32 %v1037_v22, %v1050_v33  ;;  %v1053_v37 = vsub.f32 %v1011_v21, %v1047_v34 }
 0x462   : > { %v1063_v38 = vsel %vm934_vm8, %v3109_v35, 0.0 }
 0x463   : > { %v1061_v40 = vmul.f32 1.442695, %v1054_v36  ;;  %v1059_v41 = vmul.f32 1.442695, %v1053_v37  ;;  %1064 = vadd.xlane.f32.xlu1 %v1063_v38 }
 0x465   : > { %3110 = vpow2.f32 %v1061_v40  ;;  %v3002_v40 = vld [vmem:[%s3803_s8] sm:$0xff] }
 0x466   : > { %3112 = vpow2.f32 %v1059_v41  ;;  %v3011_v41 = vld [vmem:[%s3804_s9 + $0x38] sm:$0xff] }
 0x46b   : > { %v3111_v42 = vpop.eup %3110 }
 0x46c   : > { %v3113_v43 = vpop.eup %3112  ;;  %v1072_v44 = vsel %vm934_vm8, %v3111_v42, 0.0 }
 0x46d   : > { %1073 = vadd.xlane.f32.xlu2 %v1072_v44  ;;  %v1069_v45 = vsel %vm934_vm8, %v3113_v43, 0.0  ;;  %v3010_v44 = vld [vmem:[%s3804_s9 + $0x30] sm:$0xff] }
 0x46e   : > { %1070 = vadd.xlane.f32.xlu0 %v1069_v45 }
 0x4d1   : > { %v1068_v46 = vpop.xlane.xlu2 %1067 }
 0x4d2   : > { %3114 = vrcp.f32 %v1068_v46 }
 0x4d6   : > { %v1065_v47 = vpop.xlane.xlu1 %1064 }
 0x4d7   : > { %3116 = vrcp.f32 %v1065_v47 }
 0x4d8   : > { %v3115_v48 = vpop.eup %3114 }
 0x4d9   : > { %v1080_v49 = vmul.f32 %v3115_v48, %v3107_v31 }
 0x4db   : > { %2662 = vmatmul.msk.f32.vlgmr.msrb.gmra.mxu2 %vm934_vm8, %v1080_v49 }
 0x4dc   : > { %1410 = vmatpush.bf16.msrb.mxu2 %v3011_v41  ;;  %v3021_v41 = vld [vmem:[%s3801_s6 + $0x108] sm:$0xff] }
 0x4dd   : > { %v3117_v50 = vpop.eup %3116 }
 0x4de   : > { %v1079_v51 = vmul.f32 %v3117_v50, %v3109_v35 }
 0x4e0   : > { %2661 = vmatmul.msk.f32.vlgmr.msra.gmra.mxu1 %vm934_vm8, %v1079_v51  ;;  %v1074_v52 = vpop.xlane.xlu2 %1073  ;;  %1411 = vmatpush.bf16.msrb.mxu2 %v3010_v44  ;;  %v3033_v44 = vld [vmem:[%s3801_s6 + $0x168] sm:$0xff] }
 0x4e1   : > { %v1071_v53 = vpop.xlane.xlu0 %1070  ;;  %3118 = vrcp.f32 %v1074_v52  ;;  %v3074_v52 = vld [vmem:[%s3798_s3 + $0x4] ss:$0 sm:$0xff] }
 0x4e2   : > { %3120 = vrcp.f32 %v1071_v53 }
 0x4e4   : > { %1412 = vmatpush.bf16.msrb.mxu2 %v3009_v59 }
 0x4e7   : > { %v3119_v54 = vpop.eup %3118 }
 0x4e8   : > { %v3121_v55 = vpop.eup %3120  ;;  %v1082_v56 = vmul.f32 %v3119_v54, %v3111_v42  ;;  %1413 = vmatpush.bf16.msrb.mxu2 %v3008_v60 }
 0x4e9   : > { %v1081_v57 = vmul.f32 %v3121_v55, %v3113_v43  ;;  %v3075_v55 = vld [vmem:[%s3798_s3 + $0x5] ss:$0 sm:$0xff] }
 0x4ea   : > { %2664 = vmatmul.msk.f32.vlgmr.msrb.gmra.mxu0 %vm934_vm8, %v1082_v56 }
 0x4eb   : > { %2663 = vmatmul.msk.f32.vlgmr.msrb.gmra.mxu3 %vm934_vm8, %v1081_v57 }
 0x4ec   : > { %1414 = vmatpush.bf16.msrb.mxu2 %v3007_v61 }
 0x4f0   : > { %1415 = vmatpush.bf16.msrb.mxu2 %v3006_v62 }
 0x4f4   : > { %1416 = vmatpush.bf16.msrb.mxu2 %v3005_v63  ;;  %v3027_v63 = vld [vmem:[%s3801_s6 + $0x138] sm:$0xff] }
 0x4f8   : > { %1417 = vmatpush.bf16.msrb.mxu2 %v3004_v0  ;;  %v3029_v0 = vld [vmem:[%s3801_s6 + $0x148] sm:$0xff] }
 0x55d   : > { %v1103_v2 = vpop.f32.mrf.mxu1 }
 0x55e   : > { %v1175_v3 = vpack.c.bf16 %v1103_v2, %v1103_v2  ;;  %v1126_v4 = vpop.f32.mrf.mxu2 }
 0x55f   : > { %v1176_v5 = vpack.c.bf16 %v1126_v4, %v1126_v4 }
 0x560   : > { %2665 = vmatmul.msk.bf16.vlgmr.msrb.gmra.mxu1 %vm934_vm8, %v1175_v3 }
 0x561   : > { %2666 = vmatmul.msk.bf16.vlgmr.msra.gmra.mxu2 %vm934_vm8, %v1176_v5 }
 0x567   : > { %v1172_v6 = vpop.f32.mrf.mxu0 }
 0x568   : > { %v1178_v7 = vpack.c.bf16 %v1172_v6, %v1172_v6 }
 0x56a   : > { %2668 = vmatmul.msk.bf16.vlgmr.msra.gmra.mxu0 %vm934_vm8, %v1178_v7 }
 0x56e   : > { %v1149_v9 = vpop.f32.mrf.mxu3 }
 0x56f   : > { %v1177_v10 = vpack.c.bf16 %v1149_v9, %v1149_v9 }
 0x571   : > { %2667 = vmatmul.msk.bf16.vlgmr.msra.gmra.mxu3 %vm934_vm8, %v1177_v10 }
 0x5dd   : > { %v1199_v11 = vpop.f32.mrf.mxu1 }
 0x5de   : > { %v1260_v22 = vsel %vm464_vm0, %v1199_v11, 0.0 }
 0x5e4   : > { %v1218_v13 = vpop.f32.mrf.mxu2 }
 0x5e5   : > { %v1201_v14 = vpop.f32.mrf.mxu1  ;;  %v1261_v21 = vsel %vm464_vm0, %v1218_v13, 0.0 }
 0x5e6   : > { %v1262_v23 = vadd.f32 %v1261_v21, %v1260_v22 }
 0x5e7   : > { %v1256_v15 = vpop.f32.mrf.mxu0 }
 0x5e8   : > { %v1265_v27 = vsel %vm464_vm0, %v1256_v15, 0.0 }
 0x5ec   : > { %v1220_v18 = vpop.f32.mrf.mxu2 }
 0x5ef   : > { %v1258_v20 = vpop.f32.mrf.mxu0 }
 0x5f0   : > { %v3077_v20 = vld [vmem:[%s3798_s3 + $0x7] ss:$0 sm:$0xff] }
 0x5f4   : > { %v1237_v24 = vpop.f32.mrf.mxu3 }
 0x5f5   : > { %v1263_v25 = vsel %vm464_vm0, %v1237_v24, 0.0 }
 0x5f6   : > { %v1264_v26 = vadd.f32 %v1263_v25, %v1262_v23 }
 0x5f8   : > { %v1266_v28 = vadd.f32 %v1265_v27, %v1264_v26 }
 0x5fa   : > { %v1267_v30 = vadd.f32 %v1266_v28, %v3271_v39  ;;  %v3003_v39 = vld [vmem:[%s3803_s8 + $0x8] sm:$0xff] }
 0x5fb   : > { %1327 = vmatpush.bf16.msra.mxu1 %v3003_v39 }
 0x5fc   : > { %v1239_v31 = vpop.f32.mrf.mxu3  ;;  %v3477_v32 = vadd.f32 %v3073_v29, %v1267_v30 }
 0x5fd   : > { %v3013_v31 = vld [vmem:[%s3801_s6 + $0xc8] sm:$0xff] }
 0x5fe   : > { %v1273_v33 = vsel %vm464_vm0, %v3477_v32, 0.0  ;;  %1508 = vmatpush.bf16.msrb.mxu3 %v3013_v31 }
 0x5ff   : > { %1274 = vadd.xlane.f32.xlu0 %v1273_v33  ;;  %1328 = vmatpush.bf16.msra.mxu1 %v3002_v40  ;;  %v3017_v33 = vld [vmem:[%s3801_s6 + $0xe8] sm:$0xff]  ;;  %v3019_v40 = vld [vmem:[%s3801_s6 + $0xf8] sm:$0xff] }
 0x603   : > { %1558 = vmatpush.bf16.msrb.mxu1 %v3017_v33  ;;  %v3087_v33 = vld [vmem:[%s3800_s5 + $0x16] ss:$0 sm:$0xff] }
 0x672   : > { %v1275_v34 = vpop.xlane.xlu0 %1274 }
 0x673   : > { %v1276_v35 = vmul.f32 %v1275_v34, %v3260_v19  ;;  %v3025_v34 = vld [vmem:[%s3801_s6 + $0x128] sm:$0xff] }
 0x674   : > { %1692 = vmatpush.bf16.msra.mxu2 %v3025_v34 }
 0x675   : > { %v1277_v36 = vsub.f32 %v3477_v32, %v1276_v35  ;;  %v3012_v35 = vld [vmem:[%s3801_s6 + $0xc0] sm:$0xff] }
 0x676   : > { %1509 = vmatpush.bf16.msrb.mxu3 %v3012_v35 }
 0x677   : > { %v1278_v37 = vmul.f32 %v1277_v36, %v1277_v36 }
 0x679   : > { %v1279_v38 = vsel %vm464_vm0, %v1278_v37, 0.0  ;;  %v3016_v37 = vld [vmem:[%s3801_s6 + $0xe0] sm:$0xff] }
 0x67a   : > { %1280 = vadd.xlane.f32.xlu1 %v1279_v38  ;;  %v3024_v38 = vld [vmem:[%s3801_s6 + $0x120] sm:$0xff]  ;;  %1559 = vmatpush.bf16.msrb.mxu1 %v3016_v37 }
 0x67b   : > { %1693 = vmatpush.bf16.msra.mxu2 %v3024_v38  ;;  %1583 = vmatpush.bf16.msra.mxu3 %v3019_v40 }
 0x6ed   : > { %v1281_v42 = vpop.xlane.xlu1 %1280 }
 0x6ee   : > { %v1282_v43 = vmul.f32 %v1281_v42, %v3260_v19  ;;  %v3023_v42 = vld [vmem:[%s3801_s6 + $0x118] sm:$0xff] }
 0x6f0   : > { %v1283_v45 = vadd.f32 1e-05, %v1282_v43 }
 0x6f2   : > { %3122 = vrsqrt.f32 %v1283_v45  ;;  %vm1290_vm11 = vweird.f32 %v1283_v45 }
 0x6f8   : > { %v3123_v46 = vpop.eup %3122 }
 0x6f9   : > { %v1285_v47 = vmul.f32 %v3123_v46, %v1283_v45  ;;  %vm1291_vm10 = vweird.f32 %v3123_v46  ;;  %v3018_v45 = vld [vmem:[%s3801_s6 + $0xf0] sm:$0xff] }
 0x6fa   : > { %vm1292_vm12 = vmor %vm1290_vm11, %vm1291_vm10  ;;  %1584 = vmatpush.bf16.msra.mxu3 %v3018_v45 }
 0x6fb   : > { %v1286_v48 = vmul.f32 %v3123_v46, %v1285_v47 }
 0x6fd   : > { %v1287_v49 = vmul.f32 0.5, %v1286_v48  ;;  %v3022_v48 = vld [vmem:[%s3801_s6 + $0x110] sm:$0xff] }
 0x6ff   : > { %v1288_v50 = vsub.f32 1.5, %v1287_v49  ;;  %v3032_v49 = vld [vmem:[%s3801_s6 + $0x160] sm:$0xff] }
 0x701   : > { %v1289_v51 = vmul.f32 %v3123_v46, %v1288_v50 }
 0x703   : > { %v1293_v53 = vsel %vm1292_vm12, %v3123_v46, %v1289_v51  ;;  %v3020_v46 = vld [vmem:[%s3801_s6 + $0x100] sm:$0xff] }
 0x704   : > { %v1294_v54 = vmul.f32 %v1293_v53, %v1277_v36  ;;  %v3014_v36 = vld [vmem:[%s3801_s6 + $0xd0] sm:$0xff] }
 0x706   : > { %v1296_v56 = vmul.f32 %v3074_v52, %v1294_v54 }
 0x708   : > { %v1298_v57 = vadd.f32 %v3075_v55, %v1296_v56  ;;  %v3078_v56 = vld [vmem:[%s3798_s3 + $0x8] ss:$0 sm:$0xff] }
 0x70a   : > { %v1299_v58 = vpack.c.bf16 %v1298_v57, %v1298_v57 }
 0x70c   : > { %2677 = vmatmul.msk.bf16.vlgmr.msra.gmra.mxu1 %vm464_vm0, %v1299_v58  ;;  %v3079_v58 = vld [vmem:[%s3798_s3 + $0x9] ss:$0 sm:$0xff] }
 0x70d   : > { %1667 = vmatpush.bf16.msra.mxu1 %v3023_v42 }
 0x711   : > { %1668 = vmatpush.bf16.msra.mxu1 %v3022_v48 }
 0x789   : > { %v1330_v2 = vpop.f32.mrf.mxu1 }
 0x78a   : > { %v1331_v3 = vadd.f32 %v3076_v1, %v1330_v2  ;;  %v3031_v1 = vld [vmem:[%s3801_s6 + $0x158] sm:$0xff]  ;;  %v3026_v2 = vld [vmem:[%s3801_s6 + $0x130] sm:$0xff] }
 0x78c   : > { %v1335_v4 = vmul.f32 %v1331_v3, %v1331_v3  ;;  %v1334_v13 = vmul.f32 0.5, %v1331_v3 }
 0x78e   : > { %v1336_v5 = vmul.f32 %v1335_v4, %v1331_v3  ;;  %v3030_v4 = vld [vmem:[%s3801_s6 + $0x150] sm:$0xff] }
 0x790   : > { %v1337_v6 = vmul.f32 0.044715, %v1336_v5  ;;  %v3035_v5 = vld [vmem:[%s3801_s6 + $0x178] sm:$0xff] }
 0x791   : > { %v1332_v7 = vpop.f32.mrf.mxu1 }
 0x792   : > { %v1338_v9 = vadd.f32 %v1337_v6, %v1331_v3  ;;  %v3028_v3 = vld [vmem:[%s3801_s6 + $0x140] sm:$0xff]  ;;  %v3034_v6 = vld [vmem:[%s3801_s6 + $0x170] sm:$0xff] }
 0x794   : > { %v1339_v10 = vmul.f32 0.7978846, %v1338_v9 }
 0x796   : > { %3124 = vtanh.f32 %v1339_v10  ;;  %v3083_v10 = vld [vmem:[%s3800_s5 + $0x12] ss:$0 sm:$0xff] }
 0x79c   : > { %v3125_v11 = vpop.eup %3124 }
 0x79d   : > { %v1341_v14 = vadd.f32 1.0, %v3125_v11 }
 0x79f   : > { %v1342_v15 = vmul.f32 %v1341_v14, %v1334_v13  ;;  %v3081_v13 = vld [vmem:[%s3800_s5 + $0xe] ss:$0 sm:$0xff] }
 0x7a1   : > { %v1343_v18 = vpack.c.bf16 %v1342_v15, %v1342_v15 }
 0x7a3   : > { %1418 = vmatmul.bf16.vlgmr.msrb.gmra.mxu2 %v1343_v18 }
 0x7a4   : > { %1826 = vmatpush.bf16.msrb.mxu2 %v3033_v44 }
 0x7a8   : > { %1827 = vmatpush.bf16.msrb.mxu2 %v3032_v49  ;;  %v3090_v49 = vld [vmem:[%s3800_s5 + $0x13] ss:$0 sm:$0xff] }
 0x826   : > { %v1419_v21 = vpop.f32.mrf.mxu2 }
 0x827   : > { %v1420_v22 = vadd.f32 %v3077_v20, %v1419_v21 }
 0x829   : > { %v3529_v23 = vadd.f32 %v1420_v22, %v3477_v32  ;;  %v3015_v32 = vld [vmem:[%s3801_s6 + $0xd8] sm:$0xff]  ;;  %v3084_v22 = vld [vmem:[%s3800_s5 + $0x10] ss:$0 sm:$0xff] }
 0x82a   : > { %1533 = vmatpush.bf16.msrb.mxu0 %v3015_v32 }
 0x82b   : > { %v1426_v24 = vsel %vm464_vm0, %v3529_v23, 0.0 }
 0x82c   : > { %1427 = vadd.xlane.f32.xlu2 %v1426_v24 }
 0x82e   : > { %v1421_v25 = vpop.f32.mrf.mxu2  ;;  %1534 = vmatpush.bf16.msrb.mxu0 %v3014_v36  ;;  %v3080_v36 = vld [vmem:[%s3800_s5 + $0xd] ss:$0 sm:$0xff] }
 0x82f   : > { %v3085_v25 = vld [vmem:[%s3800_s5 + $0x11] ss:$0 sm:$0xff] }
 0x832   : > { %1642 = vmatpush.bf16.msra.mxu0 %v3021_v41  ;;  %v3088_v41 = vld [vmem:[%s3800_s5 + $0x14] ss:$0 sm:$0xff] }
 0x836   : > { %1643 = vmatpush.bf16.msra.mxu0 %v3020_v46 }
 0x89f   : > { %v1428_v26 = vpop.xlane.xlu2 %1427 }
 0x8a0   : > { %v1429_v27 = vmul.f32 %v1428_v26, %v3260_v19 }
 0x8a2   : > { %v1430_v28 = vsub.f32 %v3529_v23, %v1429_v27  ;;  %v3082_v27 = vld [vmem:[%s3800_s5 + $0xc] ss:$0 sm:$0xff] }
 0x8a4   : > { %v1431_v29 = vmul.f32 %v1430_v28, %v1430_v28 }
 0x8a6   : > { %v1432_v30 = vsel %vm464_vm0, %v1431_v29, 0.0 }
 0x8a7   : > { %1433 = vadd.xlane.f32.xlu0 %v1432_v30 }
 0x91a   : > { %v1434_v39 = vpop.xlane.xlu0 %1433 }
 0x91b   : > { %v1435_v43 = vmul.f32 %v1434_v39, %v3260_v19 }
 0x91d   : > { %v1436_v47 = vadd.f32 1e-05, %v1435_v43  ;;  %v3089_v43 = vld [vmem:[%s3800_s5 + $0x15] ss:$0 sm:$0xff] }
 0x91f   : > { %3126 = vrsqrt.f32 %v1436_v47  ;;  %vm1443_vm14 = vweird.f32 %v1436_v47 }
 0x925   : > { %v3127_v50 = vpop.eup %3126 }
 0x926   : > { %v1438_v51 = vmul.f32 %v3127_v50, %v1436_v47  ;;  %vm1444_vm13 = vweird.f32 %v3127_v50 }
 0x927   : > { %vm1445_vm15 = vmor %vm1443_vm14, %vm1444_vm13 }
 0x928   : > { %v1439_v52 = vmul.f32 %v3127_v50, %v1438_v51 }
 0x92a   : > { %v1440_v53 = vmul.f32 0.5, %v1439_v52 }
 0x92c   : > { %v1441_v54 = vsub.f32 1.5, %v1440_v53 }
 0x92e   : > { %v1442_v55 = vmul.f32 %v3127_v50, %v1441_v54 }
 0x930   : > { %v1446_v57 = vsel %vm1445_vm15, %v3127_v50, %v1442_v55  ;;  %v3086_v50 = vld [vmem:[%s3800_s5 + $0xf] ss:$0 sm:$0xff] }
 0x931   : > { %v1447_v59 = vmul.f32 %v1446_v57, %v1430_v28  ;;  %v3091_v57 = vld [vmem:[%s3800_s5 + $0x17] ss:$0 sm:$0xff] }
 0x933   : > { %v1449_v60 = vmul.f32 %v3078_v56, %v1447_v59 }
 0x935   : > { %v1451_v61 = vadd.f32 %v3079_v58, %v1449_v60 }
 0x937   : > { %v1452_v62 = vpack.c.bf16 %v1451_v61, %v1451_v61 }
 0x939   : > { %2738 = vmatmul.msk.bf16.vlgmr.msrb.gmra.mxu3 %vm464_vm0, %v1452_v62  ;;  %2747 = vmatmul.msk.bf16.vlgmr.msrb.gmra.mxu0 %vm464_vm0, %v1452_v62 }
 0x93a   : > { %2756 = vmatmul.msk.bf16.vlgmr.msrb.gmra.mxu1 %vm464_vm0, %v1452_v62  ;;  %2812 = vmatmul.msk.bf16.vlgmr.msra.gmra.mxu2 %vm464_vm0, %v1452_v62 }
 0x93b   : > { %1717 = vmatpush.bf16.msrb.mxu3 %v3027_v63  ;;  %1776 = vmatpush.bf16.msrb.mxu0 %v3029_v0 }
 0x93c   : > { %1801 = vmatpush.bf16.msrb.mxu1 %v3031_v1 }
 0x93f   : > { %1718 = vmatpush.bf16.msrb.mxu3 %v3026_v2  ;;  %1777 = vmatpush.bf16.msrb.mxu0 %v3028_v3 }
 0x940   : > { %1802 = vmatpush.bf16.msrb.mxu1 %v3030_v4 }
 0x949   : > { %2765 = vmatmul.msk.bf16.vlgmr.msra.gmra.mxu3 %vm464_vm0, %v1452_v62  ;;  %2794 = vmatmul.msk.bf16.vlgmr.msra.gmra.mxu0 %vm464_vm0, %v1452_v62 }
 0x94a   : > { %2803 = vmatmul.msk.bf16.vlgmr.msra.gmra.mxu1 %vm464_vm0, %v1452_v62  ;;  %2868 = vmatmul.msk.bf16.vlgmr.msrb.gmra.mxu2 %vm464_vm0, %v1452_v62 }
 0x94b   : > { %1851 = vmatpush.bf16.msra.mxu3 %v3035_v5 }
 0x94f   : > { %1852 = vmatpush.bf16.msra.mxu3 %v3034_v6 }
 0x959   : > { %2821 = vmatmul.msk.bf16.vlgmr.msrb.gmra.mxu3 %vm464_vm0, %v1452_v62  ;;  %2850 = vmatmul.msk.bf16.vlgmr.msrb.gmra.mxu0 %vm464_vm0, %v1452_v62 }
 0x95a   : > { %2859 = vmatmul.msk.bf16.vlgmr.msrb.gmra.mxu1 %vm464_vm0, %v1452_v62 }
 0x969   : > { %2877 = vmatmul.msk.bf16.vlgmr.msra.gmra.mxu3 %vm464_vm0, %v1452_v62 }
 0x9b6   : > { %v1536_v7 = vpop.f32.mrf.mxu0 }
 0x9b7   : > { %v1561_v9 = vpop.f32.mrf.mxu1  ;;  %v1537_v40 = vadd.f32 %v3080_v36, %v1536_v7 }
 0x9b8   : > { %v1562_v21 = vadd.f32 %v3081_v13, %v1561_v9 }
 0x9bc   : > { %v1511_v11 = vpop.f32.mrf.mxu3 }
 0x9bd   : > { %v1695_v14 = vpop.f32.mrf.mxu2  ;;  %v1512_v32 = vadd.f32 %v3082_v27, %v1511_v11 }
 0x9be   : > { %v1696_v15 = vadd.f32 %v3083_v10, %v1695_v14  ;;  %v1538_v18 = vpop.f32.mrf.mxu0 }
 0x9bf   : > { %v1563_v20 = vpop.f32.mrf.mxu1 }
 0x9c0   : > { %2882 = vmatpush.xpose.msk.msra.mxu1 %vm934_vm8, %v1696_v15 }
 0x9c3   : > { %2883 = vmatmul.msk.f32.vlgmr.msra.gmra.mxu1 %vm934_vm8, %v1562_v21 }
 0x9c4   : > { %v1513_v24 = vpop.f32.mrf.mxu3 }
 0x9c5   : > { %v1697_v26 = vpop.f32.mrf.mxu2 }
 0x9c6   : > { %v1645_v28 = vpop.f32.mrf.mxu0 }
 0x9c7   : > { %v1646_v29 = vadd.f32 %v3084_v22, %v1645_v28  ;;  %v1670_v30 = vpop.f32.mrf.mxu1 }
 0x9c8   : > { %v1671_v31 = vadd.f32 %v3085_v25, %v1670_v30 }
 0x9c9   : > { %2878 = vmatpush.xpose.msk.msra.mxu0 %vm934_vm8, %v1646_v29 }
 0x9cc   : > { %v1586_v34 = vpop.f32.mrf.mxu3  ;;  %2879 = vmatmul.msk.f32.vlgmr.msra.gmra.mxu0 %vm934_vm8, %v1512_v32 }
 0x9cd   : > { %2880 = vmatpush.xpose.msk.msrb.mxu0 %vm934_vm8, %v1671_v31  ;;  %v1829_v35 = vpop.f32.mrf.mxu2  ;;  %v1587_v55 = vadd.f32 %v3086_v50, %v1586_v34 }
 0x9ce   : > { %v1830_v37 = vadd.f32 %v3087_v33, %v1829_v35  ;;  %v1647_v38 = vpop.f32.mrf.mxu0 }
 0x9cf   : > { %v1672_v39 = vpop.f32.mrf.mxu1 }
 0x9d0   : > { %2070 = vmatpush.msrb.mxu1 %v1830_v37 }
 0x9d4   : > { %v1588_v42 = vpop.f32.mrf.mxu3  ;;  %2881 = vmatmul.msk.f32.vlgmr.msrb.gmra.mxu0 %vm934_vm8, %v1537_v40 }
 0x9d5   : > { %v1831_v44 = vpop.f32.mrf.mxu2 }
 0x9d6   : > { %v1779_v45 = vpop.f32.mrf.mxu0 }
 0x9d7   : > { %v1780_v46 = vadd.f32 %v3088_v41, %v1779_v45  ;;  %v1804_v47 = vpop.f32.mrf.mxu1  ;;  %v2891_v45 = vld [vmem:[%s3802_s7 + $0x14] sm:$0xf] }
 0x9d8   : > { %v1805_v48 = vadd.f32 %v3089_v43, %v1804_v47  ;;  %v2890_v43 = vld [vmem:[%s3802_s7 + $0x10] sm:$0xf]  ;;  %v2130_v47 = vsel %vm1186_vm9, %v2891_v45, 0  ;;  %v3038_v45 = vld [vmem:[%s3804_s9 + $0x40] sm:$0xff] }
 0x9d9   : > { %2024 = vmatpush.msrb.mxu3 %v1780_v46  ;;  %v2111_v44 = vsel %vm1186_vm9, %v2890_v43, 0  ;;  %v2892_v46 = vld [vmem:[%s3802_s7 + $0x18] sm:$0xf]  ;;  %v3040_v43 = vld [vmem:[%s3804_s9 + $0x50] sm:$0xff] }
 0x9da   : > { %2047 = vmatpush.msra.mxu0 %v1805_v48  ;;  %v2149_v48 = vsel %vm1186_vm9, %v2892_v46, 0  ;;  %v3095_v46 = vld [vmem:[%s3799_s4 + $0x1] ss:$0 sm:$0xff] }
 0x9db   : > { %2120 = vmatpush.bf16.msra.mxu3 %v2111_v44  ;;  %2158 = vmatpush.bf16.msra.mxu1 %v2149_v48  ;;  %v3039_v44 = vld [vmem:[%s3804_s9 + $0x48] sm:$0xff] }
 0x9dc   : > { %v1720_v51 = vpop.f32.mrf.mxu3  ;;  %2139 = vmatpush.bf16.msrb.mxu0 %v2130_v47 }
 0x9dd   : > { %v1721_v52 = vadd.f32 %v3090_v49, %v1720_v51  ;;  %v2893_v49 = vld [vmem:[%s3802_s7 + $0x1c] sm:$0xf] }
 0x9de   : > { %v1781_v53 = vpop.f32.mrf.mxu0  ;;  %v2168_v50 = vsel %vm1186_vm9, %v2893_v49, 0 }
 0x9df   : > { %v1806_v54 = vpop.f32.mrf.mxu1  ;;  %2884 = vmatpush.xpose.msk.msra.mxu2 %vm934_vm8, %v1721_v52 }
 0x9e2   : > { %2885 = vmatmul.msk.f32.vlgmr.msra.gmra.mxu2 %vm934_vm8, %v1587_v55 }
 0x9e4   : > { %v1722_v56 = vpop.f32.mrf.mxu3 }
 0x9ec   : > { %v1854_v58 = vpop.f32.mrf.mxu3 }
 0x9ed   : > { %v1855_v59 = vadd.f32 %v3091_v57, %v1854_v58 }
 0x9ef   : > { %2093 = vmatpush.msrb.mxu2 %v1855_v59 }
 0x9f1   : > { %2177 = vmatpush.bf16.msra.mxu2 %v2168_v50 }
 0x9f4   : > { %v1856_v60 = vpop.f32.mrf.mxu3 }
 0xa40   : > { %v1933_v0 = vpop.f32.mrf.mxu1 }
 0xa41   : > { %v1934_v1 = vadd.f32 %v1933_v0, %v3430_v16 }
 0xa43   : > { %v1968_v4 = vsel %vm934_vm8, %v1934_v1, -inf }
 0xa49   : > { %v1881_v61 = vpop.f32.mrf.mxu0 }
 0xa4a   : > { %v1882_v62 = vadd.f32 %v1881_v61, %v3423_v12 }
 0xa4c   : > { %v1962_v63 = vsel %vm934_vm8, %v1882_v62, -inf }
 0xa4d   : > { %1963 = vmax.xlane.f32.xlu1 %v1962_v63 }
 0xa51   : > { %v1907_v2 = vpop.f32.mrf.mxu0 }
 0xa52   : > { %v1908_v3 = vadd.f32 %v1907_v2, %v3416_v8 }
 0xa54   : > { %v1965_v5 = vsel %vm934_vm8, %v1908_v3, -inf }
 0xa55   : > { %1969 = vmax.xlane.f32.xlu1 %v1968_v4  ;;  %1966 = vmax.xlane.f32.xlu0 %v1965_v5 }
 0xa65   : > { %v1959_v6 = vpop.f32.mrf.mxu2 }
 0xa66   : > { %v1960_v7 = vadd.f32 %v1959_v6, %v3435_v17 }
 0xa68   : > { %v1971_v12 = vsel %vm934_vm8, %v1960_v7, -inf }
 0xa69   : > { %1972 = vmax.xlane.f32.xlu2 %v1971_v12 }
 0xac0   : > { %v1964_v9 = vpop.xlane.xlu1 %1963 }
 0xac1   : > { %v1974_v10 = vsub.f32 %v1882_v62, %v1964_v9  ;;  %v3092_v9 = vld [vmem:[%s3798_s3 + $0xc] ss:$0 sm:$0xff] }
 0xac3   : > { %v1978_v11 = vmul.f32 1.442695, %v1974_v10 }
 0xac5   : > { %3128 = vpow2.f32 %v1978_v11 }
 0xac8   : > { %v1970_v16 = vpop.xlane.xlu1 %1969  ;;  %v1967_v13 = vpop.xlane.xlu0 %1966 }
 0xac9   : > { %v1976_v14 = vsub.f32 %v1934_v1, %v1970_v16  ;;  %v1975_v8 = vsub.f32 %v1908_v3, %v1967_v13 }
 0xacb   : > { %v3129_v15 = vpop.eup %3128  ;;  %v1982_v18 = vmul.f32 1.442695, %v1976_v14  ;;  %v1980_v20 = vmul.f32 1.442695, %v1975_v8 }
 0xacc   : > { %v1986_v21 = vsel %vm934_vm8, %v3129_v15, 0.0 }
 0xacd   : > { %3130 = vpow2.f32 %v1982_v18  ;;  %1987 = vadd.xlane.f32.xlu2 %v1986_v21  ;;  %v3036_v21 = vld [vmem:[%s3803_s8 + $0x10] sm:$0xff] }
 0xace   : > { %3132 = vpow2.f32 %v1980_v20 }
 0xad3   : > { %v3131_v17 = vpop.eup %3130 }
 0xad4   : > { %v3133_v22 = vpop.eup %3132  ;;  %v1992_v24 = vsel %vm934_vm8, %v3131_v17, 0.0 }
 0xad5   : > { %1993 = vadd.xlane.f32.xlu2 %v1992_v24  ;;  %v1989_v25 = vsel %vm934_vm8, %v3133_v22, 0.0 }
 0xad6   : > { %1990 = vadd.xlane.f32.xlu1 %v1989_v25  ;;  %v3044_v25 = vld [vmem:[%s3804_s9 + $0x70] sm:$0xff] }
 0xadc   : > { %v1973_v26 = vpop.xlane.xlu2 %1972 }
 0xadd   : > { %v1977_v27 = vsub.f32 %v1960_v7, %v1973_v26 }
 0xadf   : > { %v1984_v28 = vmul.f32 1.442695, %v1977_v27 }
 0xae1   : > { %3134 = vpow2.f32 %v1984_v28 }
 0xae7   : > { %v3135_v29 = vpop.eup %3134 }
 0xae8   : > { %v1995_v30 = vsel %vm934_vm8, %v3135_v29, 0.0 }
 0xae9   : > { %1996 = vadd.xlane.f32.xlu0 %v1995_v30 }
 0xb40   : > { %v1988_v31 = vpop.xlane.xlu2 %1987 }
 0xb41   : > { %3136 = vrcp.f32 %v1988_v31 }
 0xb47   : > { %v3137_v32 = vpop.eup %3136 }
 0xb48   : > { %v2002_v33 = vmul.f32 %v3137_v32, %v3129_v15  ;;  %v1994_v34 = vpop.xlane.xlu2 %1993 }
 0xb49   : > { %3138 = vrcp.f32 %v1994_v34  ;;  %v1991_v35 = vpop.xlane.xlu1 %1990 }
 0xb4a   : > { %3140 = vrcp.f32 %v1991_v35  ;;  %2886 = vmatmul.msk.f32.vlgmr.msrb.gmra.mxu3 %vm934_vm8, %v2002_v33  ;;  %v3093_v33 = vld [vmem:[%s3798_s3 + $0xa] ss:$0 sm:$0xff] }
 0xb4f   : > { %v3139_v36 = vpop.eup %3138 }
 0xb50   : > { %v3141_v37 = vpop.eup %3140  ;;  %v2004_v38 = vmul.f32 %v3139_v36, %v3131_v17  ;;  %v3045_v17 = vld [vmem:[%s3804_s9 + $0x78] sm:$0xff]  ;;  %v3094_v36 = vld [vmem:[%s3798_s3 + $0xb] ss:$0 sm:$0xff] }
 0xb51   : > { %v2003_v39 = vmul.f32 %v3141_v37, %v3133_v22 }
 0xb52   : > { %2888 = vmatmul.msk.f32.vlgmr.msrb.gmra.mxu1 %vm934_vm8, %v2004_v38 }
 0xb53   : > { %2887 = vmatmul.msk.f32.vlgmr.msra.gmra.mxu0 %vm934_vm8, %v2003_v39 }
 0xb54   : > { %2335 = vmatpush.bf16.msra.mxu0 %v3045_v17 }
 0xb58   : > { %2336 = vmatpush.bf16.msra.mxu0 %v3044_v25  ;;  %v3099_v25 = vld [vmem:[%s3799_s4 + $0x2] ss:$0 sm:$0xff] }
 0xb5c   : > { %v1997_v40 = vpop.xlane.xlu0 %1996 }
 0xb5d   : > { %3142 = vrcp.f32 %v1997_v40  ;;  %v3043_v40 = vld [vmem:[%s3804_s9 + $0x68] sm:$0xff] }
 0xb5e   : > { %2337 = vmatpush.bf16.msra.mxu0 %v3043_v40 }
 0xb63   : > { %v3143_v41 = vpop.eup %3142 }
 0xb64   : > { %v2005_v42 = vmul.f32 %v3143_v41, %v3135_v29  ;;  %v3042_v41 = vld [vmem:[%s3804_s9 + $0x60] sm:$0xff] }
 0xb65   : > { %2338 = vmatpush.bf16.msra.mxu0 %v3042_v41 }
 0xb66   : > { %2889 = vmatmul.msk.f32.vlgmr.msrb.gmra.mxu2 %vm934_vm8, %v2005_v42  ;;  %v3041_v42 = vld [vmem:[%s3804_s9 + $0x58] sm:$0xff] }
 0xb69   : > { %2339 = vmatpush.bf16.msra.mxu0 %v3041_v42 }
 0xb6d   : > { %2340 = vmatpush.bf16.msra.mxu0 %v3040_v43 }
 0xb71   : > { %2341 = vmatpush.bf16.msra.mxu0 %v3039_v44 }
 0xb75   : > { %2342 = vmatpush.bf16.msra.mxu0 %v3038_v45 }
 0xbcd   : > { %v2026_v51 = vpop.f32.mrf.mxu3 }
 0xbce   : > { %v2098_v52 = vpack.c.bf16 %v2026_v51, %v2026_v51 }
 0xbcf   : > { %v2072_v53 = vpop.f32.mrf.mxu1 }
 0xbd0   : > { %v2049_v54 = vpop.f32.mrf.mxu0  ;;  %v2100_v55 = vpack.c.bf16 %v2072_v53, %v2072_v53  ;;  %2894 = vmatmul.msk.bf16.vlgmr.msra.gmra.mxu3 %vm934_vm8, %v2098_v52 }
 0xbd1   : > { %v2099_v56 = vpack.c.bf16 %v2049_v54, %v2049_v54 }
 0xbd2   : > { %2896 = vmatmul.msk.bf16.vlgmr.msra.gmra.mxu1 %vm934_vm8, %v2100_v55 }
 0xbd3   : > { %2895 = vmatmul.msk.bf16.vlgmr.msrb.gmra.mxu0 %vm934_vm8, %v2099_v56 }
 0xbe9   : > { %v2095_v57 = vpop.f32.mrf.mxu2 }
 0xbea   : > { %v2101_v58 = vpack.c.bf16 %v2095_v57, %v2095_v57 }
 0xbec   : > { %2897 = vmatmul.msk.bf16.vlgmr.msra.gmra.mxu2 %vm934_vm8, %v2101_v58 }
 0xc4f   : > { %v2160_v59 = vpop.f32.mrf.mxu1 }
 0xc50   : > { %v2141_v60 = vpop.f32.mrf.mxu0  ;;  %v2186_v4 = vsel %vm464_vm0, %v2160_v59, 0.0 }
 0xc51   : > { %v2184_v2 = vsel %vm464_vm0, %v2141_v60, 0.0  ;;  %v3096_v60 = vld [vmem:[%s3798_s3 + $0xd] ss:$0 sm:$0xff] }
 0xc53   : > { %v2122_v61 = vpop.f32.mrf.mxu3 }
 0xc54   : > { %v2183_v1 = vsel %vm464_vm0, %v2122_v61, 0.0 }
 0xc55   : > { %v2185_v3 = vadd.f32 %v2184_v2, %v2183_v1 }
 0xc57   : > { %v2162_v62 = vpop.f32.mrf.mxu1  ;;  %v2187_v6 = vadd.f32 %v2186_v4, %v2185_v3 }
 0xc58   : > { %v2143_v63 = vpop.f32.mrf.mxu0 }
 0xc5b   : > { %v2124_v0 = vpop.f32.mrf.mxu3 }
 0xc6f   : > { %v2179_v5 = vpop.f32.mrf.mxu2 }
 0xc70   : > { %v2188_v7 = vsel %vm464_vm0, %v2179_v5, 0.0 }
 0xc71   : > { %v2189_v12 = vadd.f32 %v2188_v7, %v2187_v6  ;;  %v3047_v7 = vld [vmem:[%s3805_s10 + $0x8] sm:$0xff] }
 0xc72   : > { %2405 = vmatpush.bf16.msrb.mxu1 %v3047_v7 }
 0xc73   : > { %v2190_v10 = vadd.f32 %v2189_v12, %v3529_v23  ;;  %v3037_v23 = vld [vmem:[%s3803_s8 + $0x18] sm:$0xff]  ;;  %v3046_v12 = vld [vmem:[%s3805_s10] sm:$0xff] }
 0xc74   : > { %2251 = vmatpush.bf16.msrb.mxu3 %v3037_v23 }
 0xc75   : > { %v3715_v11 = vadd.f32 %v3092_v9, %v2190_v10 }
 0xc76   : > { %2406 = vmatpush.bf16.msrb.mxu1 %v3046_v12 }
 0xc77   : > { %v2181_v16 = vpop.f32.mrf.mxu2  ;;  %v2196_v13 = vsel %vm464_vm0, %v3715_v11, 0.0 }
 0xc78   : > { %2197 = vadd.xlane.f32.xlu0 %v2196_v13  ;;  %2252 = vmatpush.bf16.msrb.mxu3 %v3036_v21 }
 0xceb   : > { %v2198_v14 = vpop.xlane.xlu0 %2197 }
 0xcec   : > { %v2199_v8 = vmul.f32 %v2198_v14, %v3260_v19 }
 0xcee   : > { %v2200_v15 = vsub.f32 %v3715_v11, %v2199_v8 }
 0xcf0   : > { %v2201_v18 = vmul.f32 %v2200_v15, %v2200_v15 }
 0xcf2   : > { %v2202_v20 = vsel %vm464_vm0, %v2201_v18, 0.0 }
 0xcf3   : > { %2203 = vadd.xlane.f32.xlu1 %v2202_v20  ;;  %v3097_v20 = vld [vmem:[%s3798_s3 + $0xe] ss:$0 sm:$0xff] }
 0xd66   : > { %v2204_v22 = vpop.xlane.xlu1 %2203 }
 0xd67   : > { %v2205_v24 = vmul.f32 %v2204_v22, %v3260_v19 }
 0xd69   : > { %v2206_v26 = vadd.f32 1e-05, %v2205_v24 }
 0xd6b   : > { %3144 = vrsqrt.f32 %v2206_v26  ;;  %vm2213_vm2 = vweird.f32 %v2206_v26 }
 0xd71   : > { %v3145_v27 = vpop.eup %3144 }
 0xd72   : > { %v2208_v28 = vmul.f32 %v3145_v27, %v2206_v26  ;;  %vm2214_vm1 = vweird.f32 %v3145_v27 }
 0xd73   : > { %vm2215_vm3 = vmor %vm2213_vm2, %vm2214_vm1 }
 0xd74   : > { %v2209_v29 = vmul.f32 %v3145_v27, %v2208_v28 }
 0xd76   : > { %v2210_v30 = vmul.f32 0.5, %v2209_v29 }
 0xd78   : > { %v2211_v31 = vsub.f32 1.5, %v2210_v30 }
 0xd7a   : > { %v2212_v32 = vmul.f32 %v3145_v27, %v2211_v31 }
 0xd7c   : > { %v2216_v34 = vsel %vm2215_vm3, %v3145_v27, %v2212_v32 }
 0xd7d   : > { %v2217_v35 = vmul.f32 %v2216_v34, %v2200_v15 }
 0xd7f   : > { %v2219_v37 = vmul.f32 %v3093_v33, %v2217_v35 }
 0xd81   : > { %v2221_v38 = vadd.f32 %v3094_v36, %v2219_v37 }
 0xd83   : > { %v2222_v39 = vpack.c.bf16 %v2221_v38, %v2221_v38 }
 0xd85   : > { %2910 = vmatmul.msk.bf16.vlgmr.msrb.gmra.mxu3 %vm464_vm0, %v2222_v39 }
 0xe08   : > { %v2254_v47 = vpop.f32.mrf.mxu3 }
 0xe09   : > { %v2255_v48 = vadd.f32 %v3095_v46, %v2254_v47 }
 0xe0b   : > { %v2259_v49 = vmul.f32 %v2255_v48, %v2255_v48  ;;  %v2258_v56 = vmul.f32 0.5, %v2255_v48 }
 0xe0d   : > { %v2260_v50 = vmul.f32 %v2259_v49, %v2255_v48 }
 0xe0f   : > { %v2261_v51 = vmul.f32 0.044715, %v2260_v50 }
 0xe10   : > { %v2256_v52 = vpop.f32.mrf.mxu3 }
 0xe11   : > { %v2262_v53 = vadd.f32 %v2261_v51, %v2255_v48 }
 0xe13   : > { %v2263_v54 = vmul.f32 0.7978846, %v2262_v53 }
 0xe15   : > { %3146 = vtanh.f32 %v2263_v54 }
 0xe1b   : > { %v3147_v55 = vpop.eup %3146 }
 0xe1c   : > { %v2265_v57 = vadd.f32 1.0, %v3147_v55 }
 0xe1e   : > { %v2266_v58 = vmul.f32 %v2265_v57, %v2258_v56 }
 0xe20   : > { %v2267_v59 = vpack.c.bf16 %v2266_v58, %v2266_v58 }
 0xe22   : > { %2343 = vmatmul.bf16.vlgmr.msra.gmra.mxu0 %v2267_v59 }
 0xe9f   : > { %v2344_v61 = vpop.f32.mrf.mxu0 }
 0xea0   : > { %v2345_v62 = vadd.f32 %v3096_v60, %v2344_v61 }
 0xea2   : > { %v2348_v63 = vadd.f32 %v2345_v62, %v3715_v11 }
 0xea4   : > { %v2351_v0 = vsel %vm464_vm0, %v2348_v63, 0.0 }
 0xea5   : > { %2352 = vadd.xlane.f32.xlu2 %v2351_v0 }
 0xea7   : > { %v2346_v1 = vpop.f32.mrf.mxu0 }
 0xf18   : > { %v2353_v2 = vpop.xlane.xlu2 %2352 }
 0xf19   : > { %v2354_v3 = vmul.f32 %v2353_v2, %v3260_v19 }
 0xf1b   : > { %v2355_v4 = vsub.f32 %v2348_v63, %v2354_v3 }
 0xf1d   : > { %v2356_v5 = vmul.f32 %v2355_v4, %v2355_v4 }
 0xf1f   : > { %v2357_v6 = vsel %vm464_vm0, %v2356_v5, 0.0 }
 0xf20   : > { %2358 = vadd.xlane.f32.xlu0 %v2357_v6 }
 0xf93   : > { %v2359_v9 = vpop.xlane.xlu0 %2358 }
 0xf94   : > { %v2360_v10 = vmul.f32 %v2359_v9, %v3260_v19  ;;  %v3098_v19 = vld [vmem:[%s3798_s3 + $0xf] ss:$0 sm:$0xff] }
 0xf96   : > { %v2361_v11 = vadd.f32 1e-05, %v2360_v10 }
 0xf98   : > { %3148 = vrsqrt.f32 %v2361_v11  ;;  %vm2368_vm5 = vweird.f32 %v2361_v11 }
 0xf9e   : > { %v3149_v16 = vpop.eup %3148 }
 0xf9f   : > { %v2363_v13 = vmul.f32 %v3149_v16, %v2361_v11  ;;  %vm2369_vm4 = vweird.f32 %v3149_v16 }
 0xfa0   : > { %vm2370_vm6 = vmor %vm2368_vm5, %vm2369_vm4 }
 0xfa1   : > { %v2364_v14 = vmul.f32 %v3149_v16, %v2363_v13 }
 0xfa3   : > { %v2365_v8 = vmul.f32 0.5, %v2364_v14 }
 0xfa5   : > { %v2366_v15 = vsub.f32 1.5, %v2365_v8 }
 0xfa7   : > { %v2367_v18 = vmul.f32 %v3149_v16, %v2366_v15 }
 0xfa9   : > { %v2371_v23 = vsel %vm2370_vm6, %v3149_v16, %v2367_v18 }
 0xfaa   : > { %v2372_v21 = vmul.f32 %v2371_v23, %v2355_v4 }
 0xfac   : > { %v2374_v17 = vmul.f32 %v3097_v20, %v2372_v21 }
 0xfae   : > { %v2376_v22 = vadd.f32 %v3098_v19, %v2374_v17 }
 0xfb0   : > { %v2377_v24 = vpack.c.bf16 %v2376_v22, %v2376_v22 }
 0xfb2   : > { %2967 = vmatmul.msk.bf16.vlgmr.msrb.gmra.mxu1 %vm464_vm0, %v2377_v24 }
0x102f   : > { %v2408_v26 = vpop.f32.mrf.mxu1 }
0x1030   : > { %v2409_v27 = vadd.f32 %v3099_v25, %v2408_v26 }
0x1032   : > { %2412 = vst [vmem:[%s381_s16] sm:$0xff] %v2409_v27 }
0x1037   : > { %v2410_v28 = vpop.f32.mrf.mxu1 }
0x1038 PF: > { %s21_s17 = sadd.s32 1, %s3156_s17  }
0x1039   : > { %p18_p4 = scmp.ge.s32.totalorder %s21_s17, 4  }
0x103b   :  { %20 = sbr.rel (!%p18_p4) target bundleno = 1 (0x1), region = 107 }

</bundles_post_ra>
